<compile_context>
chip_gen: v6e
topology: v6e:2x2x1
jax: 0.10.0
libtpu: 0.0.40
codegen_flags: <defaults>
</compile_context>

<pallas_src>
import functools

import jax
import jax.numpy as jnp
from jax.experimental import pallas as pl
from jax.experimental.pallas import tpu as pltpu

_BN_EPS = 1e-5
_NORM_EPS = 1e-12
_KAPPA_LANES = 128  # lane-dense kappa output slab; column 0 carries the value

# Row indices inside the packed per-layer vector slab.
(_V_BE, _V_BP1, _V_GP1, _V_BETAP1, _V_BP2,
 _V_BQ1, _V_GQ1, _V_BETAQ1, _V_BQ2,
 _V_BK1, _V_GK1, _V_BETAK1, _V_WK2, _V_BK2) = range(14)
_NUM_VEC = 16  # padded to a multiple of 8 rows


def _round_up(x, m):
    return ((x + m - 1) // m) * m


def _softplus(x):
    # PyTorch F.softplus with beta=1, threshold=20.
    return jnp.where(x > 20.0, x, jnp.log1p(jnp.exp(jnp.minimum(x, 20.0))))


def _simsiam_fused_kernel(
    x1_ref, x2_ref, we_ref, wp1_ref, wp2_ref, wq1_ref, wq2_ref, wk1_ref, vec_ref,
    z_ref, mu_ref, kappa_ref, acc_ref,
    *, b_valid, bp, Fp, Lp, L4p, F4p,
):
    k = pl.program_id(0)

    @pl.when(k == 0)
    def _():
        acc_ref[...] = jnp.zeros_like(acc_ref)

    # ---- Encoder matmul, K-tiled over flattened input dim (bf16 MXU, f32 acc).
    # x arrives in f32 straight from HBM (no wrapper cast pass); cast per tile.
    w = we_ref[...]
    acc_ref[0] += jnp.dot(x1_ref[...].astype(jnp.bfloat16), w,
                          preferred_element_type=jnp.float32)
    acc_ref[1] += jnp.dot(x2_ref[...].astype(jnp.bfloat16), w,
                          preferred_element_type=jnp.float32)

    @pl.when(k == pl.num_programs(0) - 1)
    def _finalize():
        bp2 = 2 * bp
        inv_n = 1.0 / float(b_valid)
        if b_valid == bp:
            row_mask = None
        else:
            row_mask = (jax.lax.broadcasted_iota(jnp.int32, (2, bp, 1), 1)
                        < b_valid).astype(jnp.float32)

        def bn_relu_per_view(h, gamma, beta):
            # Training-mode BatchNorm1d with per-view (per-half) biased batch
            # stats over the b_valid real rows, then affine + ReLU.
            # Layout-free [2, bp, D] reshape (bp % 8 == 0), two-pass variance.
            D = h.shape[-1]
            h3 = h.reshape(2, bp, D)
            hm = h3 if row_mask is None else h3 * row_mask
            mean = jnp.sum(hm, axis=1, keepdims=True) * inv_n
            d = h3 - mean
            dm = d if row_mask is None else d * row_mask
            var = jnp.sum(dm * dm, axis=1, keepdims=True) * inv_n
            hn = d * jax.lax.rsqrt(var + _BN_EPS)
            out = jnp.maximum(hn * gamma.reshape(1, 1, D)
                              + beta.reshape(1, 1, D), 0.0)
            return out.reshape(bp2, D)

        # ---- Encoder bias + ReLU ----
        y = acc_ref[...].reshape(bp2, Fp) + vec_ref[_V_BE:_V_BE + 1, :Fp]
        y = jnp.maximum(y, 0.0)
        y_bf = y.astype(jnp.bfloat16)

        # ---- Projector: Linear -> BN -> ReLU -> Linear ----
        h = jnp.dot(y_bf, wp1_ref[...], preferred_element_type=jnp.float32)
        h = h + vec_ref[_V_BP1:_V_BP1 + 1, :Lp]
        h = bn_relu_per_view(h, vec_ref[_V_GP1:_V_GP1 + 1, :Lp],
                             vec_ref[_V_BETAP1:_V_BETAP1 + 1, :Lp])
        z = jnp.dot(h.astype(jnp.bfloat16), wp2_ref[...],
                    preferred_element_type=jnp.float32)
        z = z + vec_ref[_V_BP2:_V_BP2 + 1, :Lp]
        z_ref[...] = z

        # ---- Predictor mu: Linear -> BN -> ReLU -> Linear -> L2 normalize ----
        q = jnp.dot(z.astype(jnp.bfloat16), wq1_ref[...],
                    preferred_element_type=jnp.float32)
        q = q + vec_ref[_V_BQ1:_V_BQ1 + 1, :L4p]
        q = bn_relu_per_view(q, vec_ref[_V_GQ1:_V_GQ1 + 1, :L4p],
                             vec_ref[_V_BETAQ1:_V_BETAQ1 + 1, :L4p])
        p = jnp.dot(q.astype(jnp.bfloat16), wq2_ref[...],
                    preferred_element_type=jnp.float32)
        p = p + vec_ref[_V_BQ2:_V_BQ2 + 1, :Lp]
        ssq = jnp.sum(p * p, axis=-1, keepdims=True)
        mu_ref[...] = p * jax.lax.rsqrt(jnp.maximum(ssq, _NORM_EPS * _NORM_EPS))

        # ---- PredictorKappa (on encoder features y): Linear -> BN -> ReLU ->
        #      1-wide Linear done on the VPU (no 1-column MXU matmul) ----
        kh = jnp.dot(y_bf, wk1_ref[...], preferred_element_type=jnp.float32)
        kh = kh + vec_ref[_V_BK1:_V_BK1 + 1, :F4p]
        kh = bn_relu_per_view(kh, vec_ref[_V_GK1:_V_GK1 + 1, :F4p],
                              vec_ref[_V_BETAK1:_V_BETAK1 + 1, :F4p])
        kraw = jnp.sum(kh * vec_ref[_V_WK2:_V_WK2 + 1, :F4p],
                       axis=-1, keepdims=True)
        kraw = kraw + vec_ref[_V_BK2:_V_BK2 + 1, 0:1]
        kappa = _softplus(kraw) + 0.001
        kappa_ref[...] = jnp.broadcast_to(kappa, kappa_ref.shape)


def _vmem_cap_bytes():
    """Generation-aware scoped-VMEM cap (leave headroom below physical)."""
    phys = None
    try:
        info = pltpu.get_tpu_info()
        phys = getattr(info, "vmem_capacity_bytes", None)
    except Exception:
        phys = None
    if phys is None:
        phys = 64 << 20                       # conservative fallback (v7x-class)
    if phys <= (64 << 20):                    # v7x: 64 MiB physical -> keep headroom
        return 48 << 20
    return min(100 << 20, int(phys * 0.78))   # v5e/v6e: 128 MiB physical


def _resident_spec(shape, single_buffer):
    """BlockSpec for an operand whose block index never changes.

    When the K grid has >1 step, request a single VMEM buffer (it is DMA'd once,
    so double-buffering just wastes VMEM).  Falls back to the default spec if the
    pipeline_mode API is unavailable.
    """
    index_map = lambda k: (0,) * len(shape)
    if single_buffer and hasattr(pl, "Buffered"):
        try:
            return pl.BlockSpec(shape, index_map, pipeline_mode=pl.Buffered(1))
        except (TypeError, ValueError):
            pass
    return pl.BlockSpec(shape, index_map)


def _pad2d(a, rows, cols, dtype=None):
    if dtype is not None and a.dtype != dtype:
        a = a.astype(dtype)
    r, c = a.shape
    if r != rows or c != cols:
        a = jnp.pad(a, ((0, rows - r), (0, cols - c)))
    return a


def _simsiam_fused_forward_arrays(x1, x2, params):
    """Both SimSiamVI views through one fused Pallas call (shared weights)."""
    B = x1.shape[0]
    x1f = x1.reshape(B, -1).astype(jnp.float32)
    x2f = x2.reshape(B, -1).astype(jnp.float32)
    d_in = x1f.shape[1]

    F = params["we"].shape[1]      # feature_dim
    L = params["wp2"].shape[1]     # latent_dim
    L4 = params["wq1"].shape[1]    # latent_dim // 4
    F4 = params["wk1"].shape[1]    # feature_dim // 4

    # Lane-dense padded widths (multiples of 128).  Zero-padded weight rows/cols
    # and zero gamma/beta/bias keep padded lanes exactly zero end-to-end.
    Fp = _round_up(F, 128)
    Lp = _round_up(L, 128)
    L4p = _round_up(L4, 128)
    F4p = _round_up(F4, 128)
    vw = max(Fp, Lp, L4p, F4p)

    bp = _round_up(max(B, 8), 8)   # per-view padded batch (multiple of 8)
    bp2 = 2 * bp

    # ---- K-tile from a VMEM budget; collapse to grid=(1,) when `we` fits ----
    cap = _vmem_cap_bytes()
    resident = (4 * (Fp * Lp + Lp * Lp + Lp * L4p + L4p * Lp + Fp * F4p)  # bf16 x2buf
                + 2 * _NUM_VEC * vw * 4                                    # vec slab
                + 2 * (2 * bp2 * Lp + bp2 * _KAPPA_LANES) * 4              # outputs
                + 2 * bp * Fp * 4)                                         # accumulator
    per_tk = 2 * (2 * bp * 4 + Fp * 2)   # dbl-buffered: two f32 x tiles + bf16 we tile
    budget = max(cap - resident - (4 << 20), per_tk * 128)
    d_pad_full = _round_up(d_in, 128)
    tk_fit = max((budget // per_tk) // 128 * 128, 128)
    if tk_fit >= d_pad_full:
        tk = d_pad_full                       # whole encoder weight fits: no K loop
    else:
        tk = int(min(max(tk_fit, 512), 4096))
    d_pad = _round_up(d_in, tk)
    n_k = d_pad // tk

    est = resident + per_tk * tk
    vmem_limit = int(min(cap, max(est + (4 << 20), 32 << 20)))

    # ---- inputs: two separate f32 views, padded only when needed (no stack) ----
    x1p = _pad2d(x1f, bp, d_pad)
    x2p = _pad2d(x2f, bp, d_pad)

    # ---- matmul weights in bf16 ([in, out] layout), zero-padded to lane-dense ----
    we = _pad2d(params["we"], d_pad, Fp, jnp.bfloat16)
    wp1 = _pad2d(params["wp1"], Fp, Lp, jnp.bfloat16)
    wp2 = _pad2d(params["wp2"], Lp, Lp, jnp.bfloat16)
    wq1 = _pad2d(params["wq1"], Lp, L4p, jnp.bfloat16)
    wq2 = _pad2d(params["wq2"], L4p, Lp, jnp.bfloat16)
    wk1 = _pad2d(params["wk1"], Fp, F4p, jnp.bfloat16)

    # ---- pack all small per-layer vectors into one lane-padded f32 slab ----
    rows = {
        _V_BE: params["be"], _V_BP1: params["bp1"], _V_GP1: params["gp1"],
        _V_BETAP1: params["betap1"], _V_BP2: params["bp2"],
        _V_BQ1: params["bq1"], _V_GQ1: params["gq1"], _V_BETAQ1: params["betaq1"],
        _V_BQ2: params["bq2"], _V_BK1: params["bk1"], _V_GK1: params["gk1"],
        _V_BETAK1: params["betak1"], _V_WK2: params["wk2"], _V_BK2: params["bk2"],
    }
    vec = jnp.zeros((_NUM_VEC, vw), jnp.float32)
    for idx, v in rows.items():
        v = v.reshape(-1).astype(jnp.float32)
        vec = vec.at[idx, : v.shape[0]].set(v)

    kernel = functools.partial(
        _simsiam_fused_kernel,
        b_valid=B, bp=bp, Fp=Fp, Lp=Lp, L4p=L4p, F4p=F4p)

    single_buf = n_k > 1
    grid_spec = pltpu.PrefetchScalarGridSpec(
        num_scalar_prefetch=0,
        grid=(n_k,),
        in_specs=[
            pl.BlockSpec((bp, tk), lambda k: (0, k)),          # x1 (K-tiled)
            pl.BlockSpec((bp, tk), lambda k: (0, k)),          # x2 (K-tiled)
            pl.BlockSpec((tk, Fp), lambda k: (k, 0)),          # we (K-tiled)
            _resident_spec((Fp, Lp), single_buf),              # wp1
            _resident_spec((Lp, Lp), single_buf),              # wp2
            _resident_spec((Lp, L4p), single_buf),             # wq1
            _resident_spec((L4p, Lp), single_buf),             # wq2
            _resident_spec((Fp, F4p), single_buf),             # wk1
            _resident_spec((_NUM_VEC, vw), single_buf),        # packed vectors
        ],
        out_specs=(
            pl.BlockSpec((bp2, Lp), lambda k: (0, 0)),             # z
            pl.BlockSpec((bp2, Lp), lambda k: (0, 0)),             # mu
            pl.BlockSpec((bp2, _KAPPA_LANES), lambda k: (0, 0)),   # kappa slab
        ),
        scratch_shapes=[pltpu.VMEM((2, bp, Fp), jnp.float32)],     # encoder accumulator
    )

    z_all, mu_all, kappa_all = pl.pallas_call(
        kernel,
        out_shape=(
            jax.ShapeDtypeStruct((bp2, Lp), jnp.float32),
            jax.ShapeDtypeStruct((bp2, Lp), jnp.float32),
            jax.ShapeDtypeStruct((bp2, _KAPPA_LANES), jnp.float32),
        ),
        grid_spec=grid_spec,
        compiler_params=pltpu.CompilerParams(
            dimension_semantics=("arbitrary",),
            vmem_limit_bytes=vmem_limit),
    )(x1p, x2p, we, wp1, wp2, wq1, wq2, wk1, vec)

    z1, z2 = z_all[:B, :L], z_all[bp:bp + B, :L]
    mu1, mu2 = mu_all[:B, :L], mu_all[bp:bp + B, :L]
    kappa1, kappa2 = kappa_all[:B, :1], kappa_all[bp:bp + B, :1]
    return z1, z2, mu1, mu2, kappa1, kappa2


_forward_jit = jax.jit(_simsiam_fused_forward_arrays)


class PowerSpherical:
    """JAX mirror of the PyTorch PowerSpherical distribution wrapper."""

    def __init__(self, loc, scale):
        self.loc = loc
        self.scale = scale

    def log_prob(self, value):
        norm = jnp.maximum(
            jnp.sqrt(jnp.sum(value * value, axis=-1, keepdims=True)), _NORM_EPS)
        value = value / norm
        scale = jnp.clip(self.scale, 0.001, 10.0)
        diff = value - self.loc
        squared_term = -0.5 * jnp.sum((diff / scale) ** 2, axis=-1)
        log_term = -jnp.squeeze(jnp.log(scale), axis=-1)
        return squared_term + log_term

    @property
    def mean(self):
        return self.loc

    @property
    def variance(self):
        return self.scale ** 2


def simsiam_vi_forward(x1, x2, params):
    z1, z2, mu1, mu2, kappa1, kappa2 = _forward_jit(x1, x2, params)
    return z1, z2, PowerSpherical(mu1, kappa1), PowerSpherical(mu2, kappa2)


def init_params(key, d_in, feature_dim, latent_dim):
    l4 = latent_dim // 4
    f4 = feature_dim // 4

    def lin(k, fan_in, fan_out):
        w = (jax.random.normal(k, (fan_in, fan_out), jnp.float32)
             * (1.0 / jnp.sqrt(jnp.float32(fan_in))))
        # store matmul weights in bf16: avoids a per-call f32->bf16 HBM pass
        return w.astype(jnp.bfloat16)

    keys = jax.random.split(key, 8)
    return {
        # encoder (stand-in): Linear(d_in, feature_dim) + ReLU
        "we": lin(keys[0], d_in, feature_dim),
        "be": jnp.zeros((1, feature_dim), jnp.float32),
        # projector: Linear(F, L) + BN + ReLU + Linear(L, L)
        "wp1": lin(keys[1], feature_dim, latent_dim),
        "bp1": jnp.zeros((1, latent_dim), jnp.float32),
        "gp1": jnp.ones((1, latent_dim), jnp.float32),
        "betap1": jnp.zeros((1, latent_dim), jnp.float32),
        "wp2": lin(keys[2], latent_dim, latent_dim),
        "bp2": jnp.zeros((1, latent_dim), jnp.float32),
        # predictor_mu: Linear(L, L//4) + BN + ReLU + Linear(L//4, L)
        "wq1": lin(keys[3], latent_dim, l4),
        "bq1": jnp.zeros((1, l4), jnp.float32),
        "gq1": jnp.ones((1, l4), jnp.float32),
        "betaq1": jnp.zeros((1, l4), jnp.float32),
        "wq2": lin(keys[4], l4, latent_dim),
        "bq2": jnp.zeros((1, latent_dim), jnp.float32),
        # predictor_kappa (on feature_dim): Linear(F, F//4) + BN + ReLU + Linear(F//4, 1)
        "wk1": lin(keys[5], feature_dim, f4),
        "bk1": jnp.zeros((1, f4), jnp.float32),
        "gk1": jnp.ones((1, f4), jnp.float32),
        "betak1": jnp.zeros((1, f4), jnp.float32),
        "wk2": jax.random.normal(keys[6], (f4, 1), jnp.float32) / jnp.sqrt(jnp.float32(f4)),
        "bk2": jnp.zeros((1, 1), jnp.float32),
    }


if __name__ == "__main__":
    B, C, H, W = 2, 4, 16, 16
    feature_dim, latent_dim = 256, 128   # lane-dense (multiples of 128)

    key = jax.random.PRNGKey(0)
    k_x1, k_x2, k_p = jax.random.split(key, 3)
    x1 = jax.random.normal(k_x1, (B, C, H, W), jnp.float32)
    x2 = jax.random.normal(k_x2, (B, C, H, W), jnp.float32)
    params = init_params(k_p, C * H * W, feature_dim, latent_dim)

    z1, z2, dist1, dist2 = simsiam_vi_forward(x1, x2, params)
    jax.block_until_ready((z1, z2, dist1.loc, dist1.scale, dist2.loc, dist2.scale))

    assert z1.shape == (B, latent_dim) and z2.shape == (B, latent_dim)
    assert dist1.loc.shape == (B, latent_dim) and dist1.scale.shape == (B, 1)
    assert dist2.loc.shape == (B, latent_dim) and dist2.scale.shape == (B, 1)
    assert bool(jnp.all(jnp.isfinite(z1))) and bool(jnp.all(jnp.isfinite(z2)))
    assert bool(jnp.all(dist1.scale > 0)) and bool(jnp.all(dist2.scale > 0))
    # mu outputs are L2-normalized per row
    assert bool(jnp.allclose(jnp.linalg.norm(dist1.loc, axis=-1), 1.0, atol=1e-3))
    assert bool(jnp.allclose(jnp.linalg.norm(dist2.loc, axis=-1), 1.0, atol=1e-3))

    print("KERNEL_OK")
</pallas_src>

<mosaic_0001>
module attributes {stable_mosaic.version = 11 : i64} {
  func.func @_simsiam_fused_kernel(%arg0: i32, %arg1: memref<8x1024xf32, #tpu.memory_space<vmem>>, %arg2: memref<8x1024xf32, #tpu.memory_space<vmem>>, %arg3: memref<1024x256xbf16, #tpu.memory_space<vmem>>, %arg4: memref<256x128xbf16, #tpu.memory_space<vmem>>, %arg5: memref<128x128xbf16, #tpu.memory_space<vmem>>, %arg6: memref<128x128xbf16, #tpu.memory_space<vmem>>, %arg7: memref<128x128xbf16, #tpu.memory_space<vmem>>, %arg8: memref<256x128xbf16, #tpu.memory_space<vmem>>, %arg9: memref<16x256xf32, #tpu.memory_space<vmem>>, %arg10: memref<16x128xf32, #tpu.memory_space<vmem>>, %arg11: memref<16x128xf32, #tpu.memory_space<vmem>>, %arg12: memref<16x128xf32, #tpu.memory_space<vmem>>, %arg13: memref<2x8x256xf32, #tpu.memory_space<vmem>>) attributes {dimension_semantics = [#tpu.dimension_semantics<arbitrary>], iteration_bounds = array<i64: 1>, scalar_prefetch = 0 : i64, scratch_operands = 1 : i64, tpu.core_type = #tpu.core_type<tc>, window_params = [{transform_indices = @transform_0, window_bounds = array<i64: 8, 1024>}, {transform_indices = @transform_1, window_bounds = array<i64: 8, 1024>}, {transform_indices = @transform_2, window_bounds = array<i64: 1024, 256>}, {pipeline_mode = #tpu.pipeline_mode<synchronous>, transform_indices = @transform_3, window_bounds = array<i64: 256, 128>}, {pipeline_mode = #tpu.pipeline_mode<synchronous>, transform_indices = @transform_4, window_bounds = array<i64: 128, 128>}, {pipeline_mode = #tpu.pipeline_mode<synchronous>, transform_indices = @transform_5, window_bounds = array<i64: 128, 128>}, {pipeline_mode = #tpu.pipeline_mode<synchronous>, transform_indices = @transform_6, window_bounds = array<i64: 128, 128>}, {pipeline_mode = #tpu.pipeline_mode<synchronous>, transform_indices = @transform_7, window_bounds = array<i64: 256, 128>}, {pipeline_mode = #tpu.pipeline_mode<synchronous>, transform_indices = @transform_8, window_bounds = array<i64: 16, 256>}, {pipeline_mode = #tpu.pipeline_mode<synchronous>, transform_indices = @transform_9, window_bounds = array<i64: 16, 128>}, {pipeline_mode = #tpu.pipeline_mode<synchronous>, transform_indices = @transform_10, window_bounds = array<i64: 16, 128>}, {pipeline_mode = #tpu.pipeline_mode<synchronous>, transform_indices = @transform_11, window_bounds = array<i64: 16, 128>}]} {
    %c0_i32 = arith.constant 0 : i32
    %0 = arith.cmpi eq, %arg0, %c0_i32 : i32
    %1 = arith.extui %0 : i1 to i32
    %c0_i32_0 = arith.constant 0 : i32
    %2 = arith.cmpi ne, %1, %c0_i32_0 : i32
    scf.if %2 {
      %cst_20 = arith.constant 0.000000e+00 : f32
      %25 = vector.broadcast %cst_20 : f32 to vector<2x8x256xf32>
      %c0_21 = arith.constant 0 : index
      %c0_22 = arith.constant 0 : index
      %c0_23 = arith.constant 0 : index
      %26 = vector.load %arg13[%c0_21, %c0_22, %c0_23] : memref<2x8x256xf32, #tpu.memory_space<vmem>>, vector<2x8x256xf32>
      tpu.vector_store %arg13[%c0_21, %c0_22, %c0_23], %25 {strides = array<i32>} : memref<2x8x256xf32, #tpu.memory_space<vmem>>, vector<2x8x256xf32>,
    } else {
    }
    %c0 = arith.constant 0 : index
    %c0_1 = arith.constant 0 : index
    %3 = vector.load %arg3[%c0, %c0_1] : memref<1024x256xbf16, #tpu.memory_space<vmem>>, vector<1024x256xbf16>
    %c0_2 = arith.constant 0 : index
    %c0_3 = arith.constant 0 : index
    %c0_4 = arith.constant 0 : index
    %4 = vector.load %arg13[%c0_2, %c0_3, %c0_4] : memref<2x8x256xf32, #tpu.memory_space<vmem>>, vector<1x8x256xf32>
    %5 = vector.shape_cast %4 : vector<1x8x256xf32> to vector<8x256xf32>
    %c0_5 = arith.constant 0 : index
    %c0_6 = arith.constant 0 : index
    %6 = vector.load %arg1[%c0_5, %c0_6] : memref<8x1024xf32, #tpu.memory_space<vmem>>, vector<8x1024xf32>
    %7 = arith.truncf %6 : vector<8x1024xf32> to vector<8x1024xbf16>
    %cst = arith.constant dense<0.000000e+00> : vector<8x256xf32>
    %8 = tpu.matmul %7, %3, %cst {dimension_numbers = #tpu.dot_dimension_numbers<[1], [0], [0], [1], [0, 0, 1, 1], [], []>} : vector<8x1024xbf16>, vector<1024x256xbf16>, vector<8x256xf32> -> vector<8x256xf32>
    %9 = arith.addf %5, %8 : vector<8x256xf32>
    %c0_7 = arith.constant 0 : index
    %c0_8 = arith.constant 0 : index
    %c0_9 = arith.constant 0 : index
    %10 = vector.load %arg13[%c0_7, %c0_8, %c0_9] : memref<2x8x256xf32, #tpu.memory_space<vmem>>, vector<1x8x256xf32>
    %11 = vector.shape_cast %10 : vector<1x8x256xf32> to vector<8x256xf32>
    %12 = vector.shape_cast %9 : vector<8x256xf32> to vector<1x8x256xf32>
    tpu.vector_store %arg13[%c0_7, %c0_8, %c0_9], %12 {strides = array<i32>} : memref<2x8x256xf32, #tpu.memory_space<vmem>>, vector<1x8x256xf32>,
    %c1 = arith.constant 1 : index
    %c0_10 = arith.constant 0 : index
    %c0_11 = arith.constant 0 : index
    %13 = vector.load %arg13[%c1, %c0_10, %c0_11] : memref<2x8x256xf32, #tpu.memory_space<vmem>>, vector<1x8x256xf32>
    %14 = vector.shape_cast %13 : vector<1x8x256xf32> to vector<8x256xf32>
    %c0_12 = arith.constant 0 : index
    %c0_13 = arith.constant 0 : index
    %15 = vector.load %arg2[%c0_12, %c0_13] : memref<8x1024xf32, #tpu.memory_space<vmem>>, vector<8x1024xf32>
    %16 = arith.truncf %15 : vector<8x1024xf32> to vector<8x1024xbf16>
    %cst_14 = arith.constant dense<0.000000e+00> : vector<8x256xf32>
    %17 = tpu.matmul %16, %3, %cst_14 {dimension_numbers = #tpu.dot_dimension_numbers<[1], [0], [0], [1], [0, 0, 1, 1], [], []>} : vector<8x1024xbf16>, vector<1024x256xbf16>, vector<8x256xf32> -> vector<8x256xf32>
    %18 = arith.addf %14, %17 : vector<8x256xf32>
    %c1_15 = arith.constant 1 : index
    %c0_16 = arith.constant 0 : index
    %c0_17 = arith.constant 0 : index
    %19 = vector.load %arg13[%c1_15, %c0_16, %c0_17] : memref<2x8x256xf32, #tpu.memory_space<vmem>>, vector<1x8x256xf32>
    %20 = vector.shape_cast %19 : vector<1x8x256xf32> to vector<8x256xf32>
    %21 = vector.shape_cast %18 : vector<8x256xf32> to vector<1x8x256xf32>
    tpu.vector_store %arg13[%c1_15, %c0_16, %c0_17], %21 {strides = array<i32>} : memref<2x8x256xf32, #tpu.memory_space<vmem>>, vector<1x8x256xf32>,
    %c0_i32_18 = arith.constant 0 : i32
    %22 = arith.cmpi eq, %arg0, %c0_i32_18 : i32
    %23 = arith.extui %22 : i1 to i32
    %c0_i32_19 = arith.constant 0 : i32
    %24 = arith.cmpi ne, %23, %c0_i32_19 : i32
    scf.if %24 {
      %25 = tpu.iota {dimensions = array<i32: 1>} : vector<2x8x1xi32>
      %c2_i32 = arith.constant 2 : i32
      %26 = vector.broadcast %c2_i32 : i32 to vector<2x8x1xi32>
      %27 = arith.cmpi slt, %25, %26 : vector<2x8x1xi32>
      %28 = arith.extui %27 : vector<2x8x1xi1> to vector<2x8x1xi32>
      %29 = arith.sitofp %28 : vector<2x8x1xi32> to vector<2x8x1xf32>
      %c0_20 = arith.constant 0 : index
      %c0_21 = arith.constant 0 : index
      %c0_22 = arith.constant 0 : index
      %30 = vector.load %arg13[%c0_20, %c0_21, %c0_22] : memref<2x8x256xf32, #tpu.memory_space<vmem>>, vector<2x8x256xf32>
      %31 = vector.shape_cast %30 : vector<2x8x256xf32> to vector<16x256xf32>
      %c0_23 = arith.constant 0 : index
      %c0_24 = arith.constant 0 : index
      %32 = vector.load %arg9[%c0_23, %c0_24] : memref<16x256xf32, #tpu.memory_space<vmem>>, vector<1x256xf32>
      %33 = vector.broadcast %32 : vector<1x256xf32> to vector<16x256xf32>
      %34 = arith.addf %31, %33 : vector<16x256xf32>
      %cst_25 = arith.constant 0.000000e+00 : f32
      %35 = vector.broadcast %cst_25 : f32 to vector<16x256xf32>
      %36 = arith.maximumf %34, %35 : vector<16x256xf32>
      %37 = arith.truncf %36 : vector<16x256xf32> to vector<16x256xbf16>
      %c0_26 = arith.constant 0 : index
      %c0_27 = arith.constant 0 : index
      %38 = vector.load %arg4[%c0_26, %c0_27] : memref<256x128xbf16, #tpu.memory_space<vmem>>, vector<256x128xbf16>
      %cst_28 = arith.constant dense<0.000000e+00> : vector<16x128xf32>
      %39 = tpu.matmul %37, %38, %cst_28 {dimension_numbers = #tpu.dot_dimension_numbers<[1], [0], [0], [1], [0, 0, 1, 1], [], []>} : vector<16x256xbf16>, vector<256x128xbf16>, vector<16x128xf32> -> vector<16x128xf32>
      %c1_29 = arith.constant 1 : index
      %c0_30 = arith.constant 0 : index
      %40 = vector.load %arg9[%c1_29, %c0_30] : memref<16x256xf32, #tpu.memory_space<vmem>>, vector<1x128xf32>
      %41 = vector.broadcast %40 : vector<1x128xf32> to vector<16x128xf32>
      %42 = arith.addf %39, %41 : vector<16x128xf32>
      %c2 = arith.constant 2 : index
      %c0_31 = arith.constant 0 : index
      %43 = vector.load %arg9[%c2, %c0_31] : memref<16x256xf32, #tpu.memory_space<vmem>>, vector<1x128xf32>
      %c3 = arith.constant 3 : index
      %c0_32 = arith.constant 0 : index
      %44 = vector.load %arg9[%c3, %c0_32] : memref<16x256xf32, #tpu.memory_space<vmem>>, vector<1x128xf32>
      %45 = vector.shape_cast %42 : vector<16x128xf32> to vector<2x8x128xf32>
      %46 = vector.broadcast %29 : vector<2x8x1xf32> to vector<2x8x128xf32>
      %47 = arith.mulf %45, %46 : vector<2x8x128xf32>
      %cst_33 = arith.constant dense<0.000000e+00> : vector<2x128xf32>
      %48 = vector.multi_reduction <add>, %47, %cst_33 [1] : vector<2x8x128xf32> to vector<2x128xf32>
      %49 = vector.shape_cast %48 : vector<2x128xf32> to vector<2x1x128xf32>
      %cst_34 = arith.constant 5.000000e-01 : f32
      %50 = vector.broadcast %cst_34 : f32 to vector<2x1x128xf32>
      %51 = arith.mulf %49, %50 : vector<2x1x128xf32>
      %52 = vector.broadcast %51 : vector<2x1x128xf32> to vector<2x8x128xf32>
      %53 = arith.subf %45, %52 : vector<2x8x128xf32>
      %54 = vector.broadcast %29 : vector<2x8x1xf32> to vector<2x8x128xf32>
      %55 = arith.mulf %53, %54 : vector<2x8x128xf32>
      %56 = arith.mulf %55, %55 : vector<2x8x128xf32>
      %cst_35 = arith.constant dense<0.000000e+00> : vector<2x128xf32>
      %57 = vector.multi_reduction <add>, %56, %cst_35 [1] : vector<2x8x128xf32> to vector<2x128xf32>
      %58 = vector.shape_cast %57 : vector<2x128xf32> to vector<2x1x128xf32>
      %cst_36 = arith.constant 5.000000e-01 : f32
      %59 = vector.broadcast %cst_36 : f32 to vector<2x1x128xf32>
      %60 = arith.mulf %58, %59 : vector<2x1x128xf32>
      %cst_37 = arith.constant 9.99999974E-6 : f32
      %61 = vector.broadcast %cst_37 : f32 to vector<2x1x128xf32>
      %62 = arith.addf %60, %61 : vector<2x1x128xf32>
      %63 = math.rsqrt %62 : vector<2x1x128xf32>
      %64 = vector.broadcast %63 : vector<2x1x128xf32> to vector<2x8x128xf32>
      %65 = arith.mulf %53, %64 : vector<2x8x128xf32>
      %66 = vector.shape_cast %43 : vector<1x128xf32> to vector<1x1x128xf32>
      %67 = vector.broadcast %66 : vector<1x1x128xf32> to vector<2x8x128xf32>
      %68 = arith.mulf %65, %67 : vector<2x8x128xf32>
      %69 = vector.shape_cast %44 : vector<1x128xf32> to vector<1x1x128xf32>
      %70 = vector.broadcast %69 : vector<1x1x128xf32> to vector<2x8x128xf32>
      %71 = arith.addf %68, %70 : vector<2x8x128xf32>
      %cst_38 = arith.constant 0.000000e+00 : f32
      %72 = vector.broadcast %cst_38 : f32 to vector<2x8x128xf32>
      %73 = arith.maximumf %71, %72 : vector<2x8x128xf32>
      %74 = vector.shape_cast %73 : vector<2x8x128xf32> to vector<16x128xf32>
      %75 = arith.truncf %74 : vector<16x128xf32> to vector<16x128xbf16>
      %c0_39 = arith.constant 0 : index
      %c0_40 = arith.constant 0 : index
      %76 = vector.load %arg5[%c0_39, %c0_40] : memref<128x128xbf16, #tpu.memory_space<vmem>>, vector<128x128xbf16>
      %cst_41 = arith.constant dense<0.000000e+00> : vector<16x128xf32>
      %77 = tpu.matmul %75, %76, %cst_41 {dimension_numbers = #tpu.dot_dimension_numbers<[1], [0], [0], [1], [0, 0, 1, 1], [], []>} : vector<16x128xbf16>, vector<128x128xbf16>, vector<16x128xf32> -> vector<16x128xf32>
      %c4 = arith.constant 4 : index
      %c0_42 = arith.constant 0 : index
      %78 = vector.load %arg9[%c4, %c0_42] : memref<16x256xf32, #tpu.memory_space<vmem>>, vector<1x128xf32>
      %79 = vector.broadcast %78 : vector<1x128xf32> to vector<16x128xf32>
      %80 = arith.addf %77, %79 : vector<16x128xf32>
      %c0_43 = arith.constant 0 : index
      %c0_44 = arith.constant 0 : index
      %81 = vector.load %arg10[%c0_43, %c0_44] : memref<16x128xf32, #tpu.memory_space<vmem>>, vector<16x128xf32>
      tpu.vector_store %arg10[%c0_43, %c0_44], %80 {strides = array<i32>} : memref<16x128xf32, #tpu.memory_space<vmem>>, vector<16x128xf32>,
      %82 = arith.truncf %80 : vector<16x128xf32> to vector<16x128xbf16>
      %c0_45 = arith.constant 0 : index
      %c0_46 = arith.constant 0 : index
      %83 = vector.load %arg6[%c0_45, %c0_46] : memref<128x128xbf16, #tpu.memory_space<vmem>>, vector<128x128xbf16>
      %cst_47 = arith.constant dense<0.000000e+00> : vector<16x128xf32>
      %84 = tpu.matmul %82, %83, %cst_47 {dimension_numbers = #tpu.dot_dimension_numbers<[1], [0], [0], [1], [0, 0, 1, 1], [], []>} : vector<16x128xbf16>, vector<128x128xbf16>, vector<16x128xf32> -> vector<16x128xf32>
      %c5 = arith.constant 5 : index
      %c0_48 = arith.constant 0 : index
      %85 = vector.load %arg9[%c5, %c0_48] : memref<16x256xf32, #tpu.memory_space<vmem>>, vector<1x128xf32>
      %86 = vector.broadcast %85 : vector<1x128xf32> to vector<16x128xf32>
      %87 = arith.addf %84, %86 : vector<16x128xf32>
      %c6 = arith.constant 6 : index
      %c0_49 = arith.constant 0 : index
      %88 = vector.load %arg9[%c6, %c0_49] : memref<16x256xf32, #tpu.memory_space<vmem>>, vector<1x128xf32>
      %c7 = arith.constant 7 : index
      %c0_50 = arith.constant 0 : index
      %89 = vector.load %arg9[%c7, %c0_50] : memref<16x256xf32, #tpu.memory_space<vmem>>, vector<1x128xf32>
      %90 = vector.shape_cast %87 : vector<16x128xf32> to vector<2x8x128xf32>
      %91 = vector.broadcast %29 : vector<2x8x1xf32> to vector<2x8x128xf32>
      %92 = arith.mulf %90, %91 : vector<2x8x128xf32>
      %cst_51 = arith.constant dense<0.000000e+00> : vector<2x128xf32>
      %93 = vector.multi_reduction <add>, %92, %cst_51 [1] : vector<2x8x128xf32> to vector<2x128xf32>
      %94 = vector.shape_cast %93 : vector<2x128xf32> to vector<2x1x128xf32>
      %cst_52 = arith.constant 5.000000e-01 : f32
      %95 = vector.broadcast %cst_52 : f32 to vector<2x1x128xf32>
      %96 = arith.mulf %94, %95 : vector<2x1x128xf32>
      %97 = vector.broadcast %96 : vector<2x1x128xf32> to vector<2x8x128xf32>
      %98 = arith.subf %90, %97 : vector<2x8x128xf32>
      %99 = vector.broadcast %29 : vector<2x8x1xf32> to vector<2x8x128xf32>
      %100 = arith.mulf %98, %99 : vector<2x8x128xf32>
      %101 = arith.mulf %100, %100 : vector<2x8x128xf32>
      %cst_53 = arith.constant dense<0.000000e+00> : vector<2x128xf32>
      %102 = vector.multi_reduction <add>, %101, %cst_53 [1] : vector<2x8x128xf32> to vector<2x128xf32>
      %103 = vector.shape_cast %102 : vector<2x128xf32> to vector<2x1x128xf32>
      %cst_54 = arith.constant 5.000000e-01 : f32
      %104 = vector.broadcast %cst_54 : f32 to vector<2x1x128xf32>
      %105 = arith.mulf %103, %104 : vector<2x1x128xf32>
      %cst_55 = arith.constant 9.99999974E-6 : f32
      %106 = vector.broadcast %cst_55 : f32 to vector<2x1x128xf32>
      %107 = arith.addf %105, %106 : vector<2x1x128xf32>
      %108 = math.rsqrt %107 : vector<2x1x128xf32>
      %109 = vector.broadcast %108 : vector<2x1x128xf32> to vector<2x8x128xf32>
      %110 = arith.mulf %98, %109 : vector<2x8x128xf32>
      %111 = vector.shape_cast %88 : vector<1x128xf32> to vector<1x1x128xf32>
      %112 = vector.broadcast %111 : vector<1x1x128xf32> to vector<2x8x128xf32>
      %113 = arith.mulf %110, %112 : vector<2x8x128xf32>
      %114 = vector.shape_cast %89 : vector<1x128xf32> to vector<1x1x128xf32>
      %115 = vector.broadcast %114 : vector<1x1x128xf32> to vector<2x8x128xf32>
      %116 = arith.addf %113, %115 : vector<2x8x128xf32>
      %cst_56 = arith.constant 0.000000e+00 : f32
      %117 = vector.broadcast %cst_56 : f32 to vector<2x8x128xf32>
      %118 = arith.maximumf %116, %117 : vector<2x8x128xf32>
      %119 = vector.shape_cast %118 : vector<2x8x128xf32> to vector<16x128xf32>
      %120 = arith.truncf %119 : vector<16x128xf32> to vector<16x128xbf16>
      %c0_57 = arith.constant 0 : index
      %c0_58 = arith.constant 0 : index
      %121 = vector.load %arg7[%c0_57, %c0_58] : memref<128x128xbf16, #tpu.memory_space<vmem>>, vector<128x128xbf16>
      %cst_59 = arith.constant dense<0.000000e+00> : vector<16x128xf32>
      %122 = tpu.matmul %120, %121, %cst_59 {dimension_numbers = #tpu.dot_dimension_numbers<[1], [0], [0], [1], [0, 0, 1, 1], [], []>} : vector<16x128xbf16>, vector<128x128xbf16>, vector<16x128xf32> -> vector<16x128xf32>
      %c8 = arith.constant 8 : index
      %c0_60 = arith.constant 0 : index
      %123 = vector.load %arg9[%c8, %c0_60] : memref<16x256xf32, #tpu.memory_space<vmem>>, vector<1x128xf32>
      %124 = vector.broadcast %123 : vector<1x128xf32> to vector<16x128xf32>
      %125 = arith.addf %122, %124 : vector<16x128xf32>
      %126 = arith.mulf %125, %125 : vector<16x128xf32>
      %cst_61 = arith.constant dense<0.000000e+00> : vector<16xf32>
      %127 = vector.multi_reduction <add>, %126, %cst_61 [1] : vector<16x128xf32> to vector<16xf32>
      %128 = vector.shape_cast %127 : vector<16xf32> to vector<16x1xf32>
      %cst_62 = arith.constant 1.000000e-24 : f32
      %129 = vector.broadcast %cst_62 : f32 to vector<16x1xf32>
      %130 = arith.maximumf %128, %129 : vector<16x1xf32>
      %131 = math.rsqrt %130 : vector<16x1xf32>
      %132 = vector.broadcast %131 : vector<16x1xf32> to vector<16x128xf32>
      %133 = arith.mulf %125, %132 : vector<16x128xf32>
      %c0_63 = arith.constant 0 : index
      %c0_64 = arith.constant 0 : index
      %134 = vector.load %arg11[%c0_63, %c0_64] : memref<16x128xf32, #tpu.memory_space<vmem>>, vector<16x128xf32>
      tpu.vector_store %arg11[%c0_63, %c0_64], %133 {strides = array<i32>} : memref<16x128xf32, #tpu.memory_space<vmem>>, vector<16x128xf32>,
      %c0_65 = arith.constant 0 : index
      %c0_66 = arith.constant 0 : index
      %135 = vector.load %arg8[%c0_65, %c0_66] : memref<256x128xbf16, #tpu.memory_space<vmem>>, vector<256x128xbf16>
      %cst_67 = arith.constant dense<0.000000e+00> : vector<16x128xf32>
      %136 = tpu.matmul %37, %135, %cst_67 {dimension_numbers = #tpu.dot_dimension_numbers<[1], [0], [0], [1], [0, 0, 1, 1], [], []>} : vector<16x256xbf16>, vector<256x128xbf16>, vector<16x128xf32> -> vector<16x128xf32>
      %c9 = arith.constant 9 : index
      %c0_68 = arith.constant 0 : index
      %137 = vector.load %arg9[%c9, %c0_68] : memref<16x256xf32, #tpu.memory_space<vmem>>, vector<1x128xf32>
      %138 = vector.broadcast %137 : vector<1x128xf32> to vector<16x128xf32>
      %139 = arith.addf %136, %138 : vector<16x128xf32>
      %c10 = arith.constant 10 : index
      %c0_69 = arith.constant 0 : index
      %140 = vector.load %arg9[%c10, %c0_69] : memref<16x256xf32, #tpu.memory_space<vmem>>, vector<1x128xf32>
      %c11 = arith.constant 11 : index
      %c0_70 = arith.constant 0 : index
      %141 = vector.load %arg9[%c11, %c0_70] : memref<16x256xf32, #tpu.memory_space<vmem>>, vector<1x128xf32>
      %142 = vector.shape_cast %139 : vector<16x128xf32> to vector<2x8x128xf32>
      %143 = vector.broadcast %29 : vector<2x8x1xf32> to vector<2x8x128xf32>
      %144 = arith.mulf %142, %143 : vector<2x8x128xf32>
      %cst_71 = arith.constant dense<0.000000e+00> : vector<2x128xf32>
      %145 = vector.multi_reduction <add>, %144, %cst_71 [1] : vector<2x8x128xf32> to vector<2x128xf32>
      %146 = vector.shape_cast %145 : vector<2x128xf32> to vector<2x1x128xf32>
      %cst_72 = arith.constant 5.000000e-01 : f32
      %147 = vector.broadcast %cst_72 : f32 to vector<2x1x128xf32>
      %148 = arith.mulf %146, %147 : vector<2x1x128xf32>
      %149 = vector.broadcast %148 : vector<2x1x128xf32> to vector<2x8x128xf32>
      %150 = arith.subf %142, %149 : vector<2x8x128xf32>
      %151 = vector.broadcast %29 : vector<2x8x1xf32> to vector<2x8x128xf32>
      %152 = arith.mulf %150, %151 : vector<2x8x128xf32>
      %153 = arith.mulf %152, %152 : vector<2x8x128xf32>
      %cst_73 = arith.constant dense<0.000000e+00> : vector<2x128xf32>
      %154 = vector.multi_reduction <add>, %153, %cst_73 [1] : vector<2x8x128xf32> to vector<2x128xf32>
      %155 = vector.shape_cast %154 : vector<2x128xf32> to vector<2x1x128xf32>
      %cst_74 = arith.constant 5.000000e-01 : f32
      %156 = vector.broadcast %cst_74 : f32 to vector<2x1x128xf32>
      %157 = arith.mulf %155, %156 : vector<2x1x128xf32>
      %cst_75 = arith.constant 9.99999974E-6 : f32
      %158 = vector.broadcast %cst_75 : f32 to vector<2x1x128xf32>
      %159 = arith.addf %157, %158 : vector<2x1x128xf32>
      %160 = math.rsqrt %159 : vector<2x1x128xf32>
      %161 = vector.broadcast %160 : vector<2x1x128xf32> to vector<2x8x128xf32>
      %162 = arith.mulf %150, %161 : vector<2x8x128xf32>
      %163 = vector.shape_cast %140 : vector<1x128xf32> to vector<1x1x128xf32>
      %164 = vector.broadcast %163 : vector<1x1x128xf32> to vector<2x8x128xf32>
      %165 = arith.mulf %162, %164 : vector<2x8x128xf32>
      %166 = vector.shape_cast %141 : vector<1x128xf32> to vector<1x1x128xf32>
      %167 = vector.broadcast %166 : vector<1x1x128xf32> to vector<2x8x128xf32>
      %168 = arith.addf %165, %167 : vector<2x8x128xf32>
      %cst_76 = arith.constant 0.000000e+00 : f32
      %169 = vector.broadcast %cst_76 : f32 to vector<2x8x128xf32>
      %170 = arith.maximumf %168, %169 : vector<2x8x128xf32>
      %171 = vector.shape_cast %170 : vector<2x8x128xf32> to vector<16x128xf32>
      %c12 = arith.constant 12 : index
      %c0_77 = arith.constant 0 : index
      %172 = vector.load %arg9[%c12, %c0_77] : memref<16x256xf32, #tpu.memory_space<vmem>>, vector<1x128xf32>
      %173 = vector.broadcast %172 : vector<1x128xf32> to vector<16x128xf32>
      %174 = arith.mulf %171, %173 : vector<16x128xf32>
      %cst_78 = arith.constant dense<0.000000e+00> : vector<16xf32>
      %175 = vector.multi_reduction <add>, %174, %cst_78 [1] : vector<16x128xf32> to vector<16xf32>
      %176 = vector.shape_cast %175 : vector<16xf32> to vector<16x1xf32>
      %c13 = arith.constant 13 : index
      %c0_79 = arith.constant 0 : index
      %177 = vector.load %arg9[%c13, %c0_79] : memref<16x256xf32, #tpu.memory_space<vmem>>, vector<1x1xf32>
      %178 = vector.broadcast %177 : vector<1x1xf32> to vector<16x1xf32>
      %179 = arith.addf %176, %178 : vector<16x1xf32>
      %cst_80 = arith.constant 2.000000e+01 : f32
      %180 = vector.broadcast %cst_80 : f32 to vector<16x1xf32>
      %181 = arith.cmpf ogt, %179, %180 : vector<16x1xf32>
      %cst_81 = arith.constant 2.000000e+01 : f32
      %182 = vector.broadcast %cst_81 : f32 to vector<16x1xf32>
      %183 = arith.minimumf %179, %182 : vector<16x1xf32>
      %184 = math.exp %183 : vector<16x1xf32>
      %185 = math.log1p %184 : vector<16x1xf32>
      %186 = arith.select %181, %179, %185 : vector<16x1xi1>, vector<16x1xf32>
      %cst_82 = arith.constant 1.000000e-03 : f32
      %187 = vector.broadcast %cst_82 : f32 to vector<16x1xf32>
      %188 = arith.addf %186, %187 : vector<16x1xf32>
      %189 = vector.shape_cast %188 : vector<16x1xf32> to vector<16x1xf32>
      %190 = vector.broadcast %189 : vector<16x1xf32> to vector<16x128xf32>
      %c0_83 = arith.constant 0 : index
      %c0_84 = arith.constant 0 : index
      %191 = vector.load %arg12[%c0_83, %c0_84] : memref<16x128xf32, #tpu.memory_space<vmem>>, vector<16x128xf32>
      tpu.vector_store %arg12[%c0_83, %c0_84], %190 {strides = array<i32>} : memref<16x128xf32, #tpu.memory_space<vmem>>, vector<16x128xf32>,
    } else {
    }
    return
  }
  func.func @transform_0(%arg0: i32) -> (i32, i32) {
    %c0_i32 = arith.constant 0 : i32
    %c0_i32_0 = arith.constant 0 : i32
    return %c0_i32, %arg0 : i32, i32
  }
  func.func @transform_1(%arg0: i32) -> (i32, i32) {
    %c0_i32 = arith.constant 0 : i32
    %c0_i32_0 = arith.constant 0 : i32
    return %c0_i32, %arg0 : i32, i32
  }
  func.func @transform_2(%arg0: i32) -> (i32, i32) {
    %c0_i32 = arith.constant 0 : i32
    %c0_i32_0 = arith.constant 0 : i32
    return %arg0, %c0_i32 : i32, i32
  }
  func.func @transform_3(%arg0: i32) -> (i32, i32) {
    %c0_i32 = arith.constant 0 : i32
    %c0_i32_0 = arith.constant 0 : i32
    %c0_i32_1 = arith.constant 0 : i32
    return %c0_i32, %c0_i32_0 : i32, i32
  }
  func.func @transform_4(%arg0: i32) -> (i32, i32) {
    %c0_i32 = arith.constant 0 : i32
    %c0_i32_0 = arith.constant 0 : i32
    %c0_i32_1 = arith.constant 0 : i32
    return %c0_i32, %c0_i32_0 : i32, i32
  }
  func.func @transform_5(%arg0: i32) -> (i32, i32) {
    %c0_i32 = arith.constant 0 : i32
    %c0_i32_0 = arith.constant 0 : i32
    %c0_i32_1 = arith.constant 0 : i32
    return %c0_i32, %c0_i32_0 : i32, i32
  }
  func.func @transform_6(%arg0: i32) -> (i32, i32) {
    %c0_i32 = arith.constant 0 : i32
    %c0_i32_0 = arith.constant 0 : i32
    %c0_i32_1 = arith.constant 0 : i32
    return %c0_i32, %c0_i32_0 : i32, i32
  }
  func.func @transform_7(%arg0: i32) -> (i32, i32) {
    %c0_i32 = arith.constant 0 : i32
    %c0_i32_0 = arith.constant 0 : i32
    %c0_i32_1 = arith.constant 0 : i32
    return %c0_i32, %c0_i32_0 : i32, i32
  }
  func.func @transform_8(%arg0: i32) -> (i32, i32) {
    %c0_i32 = arith.constant 0 : i32
    %c0_i32_0 = arith.constant 0 : i32
    %c0_i32_1 = arith.constant 0 : i32
    return %c0_i32, %c0_i32_0 : i32, i32
  }
  func.func @transform_9(%arg0: i32) -> (i32, i32) {
    %c0_i32 = arith.constant 0 : i32
    %c0_i32_0 = arith.constant 0 : i32
    %c0_i32_1 = arith.constant 0 : i32
    return %c0_i32, %c0_i32_0 : i32, i32
  }
  func.func @transform_10(%arg0: i32) -> (i32, i32) {
    %c0_i32 = arith.constant 0 : i32
    %c0_i32_0 = arith.constant 0 : i32
    %c0_i32_1 = arith.constant 0 : i32
    return %c0_i32, %c0_i32_0 : i32, i32
  }
  func.func @transform_11(%arg0: i32) -> (i32, i32) {
    %c0_i32 = arith.constant 0 : i32
    %c0_i32_0 = arith.constant 0 : i32
    %c0_i32_1 = arith.constant 0 : i32
    return %c0_i32, %c0_i32_0 : i32, i32
  }
}

</mosaic_0001>

<bundles_post_ra>
// kernel: _simsiam_fused_forward_arrays.1
= control target key start
LH: loop header
LB: loop body
LE: loop exit
PB: predicated region body
PF: predicated region fallthrough
CT: control target
= control target key end

     0   :  { %17 = vsyncpa [#allocation4], 0  ;;  %s2751_s17 = smov [#allocation3]   ;;  %s4018_s0 = inlined_call_operand.vmem [shape: f32[8,1024], index: 0, kind: input, shape index: {}]   ;;  %s4019_s1 = inlined_call_operand.vmem [shape: f32[8,1024], index: 1, kind: input, shape index: {}]   ;;  %s4020_s2 = inlined_call_operand.vmem [shape: bf16[1024,256], index: 2, kind: input, shape index: {}]   ;;  %s4021_s3 = inlined_call_operand.vmem [shape: bf16[256,128], index: 3, kind: input, shape index: {}]   ;;  %s4022_s4 = inlined_call_operand.hbm [shape: bf16[128,128], index: 4, kind: input, shape index: {}]   ;;  %s4023_s5 = inlined_call_operand.vmem [shape: bf16[128,128], index: 5, kind: input, shape index: {}]   ;;  %s4024_s6 = inlined_call_operand.vmem [shape: bf16[128,128], index: 6, kind: input, shape index: {}]   ;;  %s4025_s7 = inlined_call_operand.vmem [shape: bf16[256,128], index: 7, kind: input, shape index: {}]   ;;  %s4026_s8 = inlined_call_operand.vmem [shape: f32[16,256], index: 8, kind: input, shape index: {}]   ;;  %s4027_s9 = inlined_call_operand.vmem [shape: f32[16,128], index: 9, kind: output, shape index: {0}]   ;;  %s4028_s10 = inlined_call_operand.vmem [shape: f32[16,128], index: 10, kind: output, shape index: {1}]   ;;  %s4029_s11 = inlined_call_operand.vmem [shape: f32[16,128], index: 11, kind: output, shape index: {2}]  }
   0x1   :  { %s31_s18 = sshll.u32 %s2751_s17, 4  ;;  %s32_s18 = int_to_ptr.vmem [resolvable:$true] %s31_s18 }
   0x2   :  { %s2737_s19 = scalar_lea.vmem %s32_s18, 1024  ;;  %p2742_p1 = scmp.lt.s32.totalorder %s32_s18, %s32_s18 }
   0x3   :  { %p2738_p0 = scmp.ne.s32.totalorder %s32_s18, %s2737_s19  ;;  %p2743_p2 = scmp.lt.s32.totalorder %s2737_s19, %s2737_s19 }
   0x5   :  { %p2744_p3 = por %p2743_p2, %p2742_p1 }
   0x7   :  { %p2745_p4 = pnand %p2744_p3, %p2738_p0 }
   0x9   :  { %2748 = shalt.err (!%p2745_p4)
}
   0xa   :  { %s2752_s20 = smov 64   ;;  %s2753_s21 = smov 4  }
   0xb   :  { %37 = dma.hbm_to_vmem [thread:$0]  %s4022_s4, 1024, %s32_s18, [#allocation4], %s2752_s20, %s2752_s20, %s2753_s21  }
   0xc   :  { %2749 = dma.done.wait [#allocation4], 1024  }
   0xd   :  { %2750 = vsyncadd [#allocation4], 4294966272  ;;  %v2449_v0 = vld [vmem:[%s4020_s2 + $0x74] ss:$8 sps:$4 sm:$0xff]   ;;  %v2453_v2 = vld [vmem:[%s4020_s2 + $0x70] ss:$8 sps:$4 sm:$0xff]  }
   0xe   :  { %v2451_v1 = vld [vmem:[%s4020_s2 + $0x174] ss:$8 sps:$4 sm:$0xff]   ;;  %844 = vmatprep.subr.bf16.mxu0 %v2449_v0  ;;  %v2454_v3 = vld [vmem:[%s4020_s2 + $0x170] ss:$8 sps:$4 sm:$0xff]   ;;  %v2455_v4 = vld [vmem:[%s4020_s2 + $0x64] ss:$8 sps:$4 sm:$0xff]  }
   0xf   :  { %885 = vmatprep.subr.bf16.mxu1 %v2451_v1  ;;  %845 = vmatpush1.bf16.msra.mxu0 %v2453_v2  ;;  %v2457_v5 = vld [vmem:[%s4020_s2 + $0x164] ss:$8 sps:$4 sm:$0xff]   ;;  %v2459_v6 = vld [vmem:[%s4020_s2 + $0x60] ss:$8 sps:$4 sm:$0xff]   ;;  %v2847_v8 = vld [vmem:[%s4020_s2 + $0x54] ss:$8 sps:$4 sm:$0xff]  }
  0x10   :  { %886 = vmatpush1.bf16.msra.mxu1 %v2454_v3  ;;  %846 = vmatprep.subr.bf16.mxu0 %v2455_v4  ;;  %v2460_v7 = vld [vmem:[%s4020_s2 + $0x160] ss:$8 sps:$4 sm:$0xff]   ;;  %v2852_v9 = vld [vmem:[%s4020_s2 + $0x154] ss:$8 sps:$4 sm:$0xff]   ;;  %v2857_v10 = vld [vmem:[%s4020_s2 + $0x50] ss:$8 sps:$4 sm:$0xff]  }
  0x11   :  { %887 = vmatprep.subr.bf16.mxu1 %v2457_v5  ;;  %v2862_v11 = vld [vmem:[%s4020_s2 + $0x150] ss:$8 sps:$4 sm:$0xff]   ;;  %v2867_v12 = vld [vmem:[%s4020_s2 + $0x44] ss:$8 sps:$4 sm:$0xff]   ;;  %v2879_v14 = vld [vmem:[%s4020_s2 + $0x40] ss:$8 sps:$4 sm:$0xff]  }
  0x12   :  { %v2874_v13 = vld [vmem:[%s4020_s2 + $0x144] ss:$8 sps:$4 sm:$0xff]   ;;  %v2886_v15 = vld [vmem:[%s4020_s2 + $0x140] ss:$8 sps:$4 sm:$0xff]   ;;  %v2891_v16 = vld [vmem:[%s4020_s2 + $0x34] ss:$8 sps:$4 sm:$0xff]  }
  0x13   :  { %847 = vmatpush1.bf16.msra.mxu0 %v2459_v6  ;;  %v2898_v17 = vld [vmem:[%s4020_s2 + $0x134] ss:$8 sps:$4 sm:$0xff]   ;;  %v2903_v18 = vld [vmem:[%s4020_s2 + $0x30] ss:$8 sps:$4 sm:$0xff]   ;;  %v2915_v20 = vld [vmem:[%s4020_s2 + $0x24] ss:$8 sps:$4 sm:$0xff]  }
  0x14   :  { %888 = vmatpush1.bf16.msra.mxu1 %v2460_v7  ;;  %848 = vmatprep.subr.bf16.mxu0 %v2847_v8  ;;  %v2908_v19 = vld [vmem:[%s4020_s2 + $0x130] ss:$8 sps:$4 sm:$0xff]   ;;  %v2922_v21 = vld [vmem:[%s4020_s2 + $0x124] ss:$8 sps:$4 sm:$0xff]   ;;  %v2927_v22 = vld [vmem:[%s4020_s2 + $0x20] ss:$8 sps:$4 sm:$0xff]  }
  0x15   :  { %889 = vmatprep.subr.bf16.mxu1 %v2852_v9  ;;  %v2934_v23 = vld [vmem:[%s4020_s2 + $0x120] ss:$8 sps:$4 sm:$0xff]   ;;  %v2939_v24 = vld [vmem:[%s4020_s2 + $0x14] ss:$8 sps:$4 sm:$0xff]   ;;  %v2951_v26 = vld [vmem:[%s4020_s2 + $0x10] ss:$8 sps:$4 sm:$0xff]  }
  0x16   :  { %v2946_v25 = vld [vmem:[%s4020_s2 + $0x114] ss:$8 sps:$4 sm:$0xff]   ;;  %v2956_v27 = vld [vmem:[%s4020_s2 + $0x110] ss:$8 sps:$4 sm:$0xff]   ;;  %v2963_v28 = vld [vmem:[%s4020_s2 + $0x4] ss:$8 sps:$4 sm:$0xff]  }
  0x17   :  { %849 = vmatpush1.bf16.msra.mxu0 %v2857_v10  ;;  %v2970_v29 = vld [vmem:[%s4020_s2 + $0x104] ss:$8 sps:$4 sm:$0xff]   ;;  %v2975_v30 = vld [vmem:[%s4020_s2] ss:$8 sps:$4 sm:$0xff]   ;;  %v2987_v32 = vld [vmem:[%s4020_s2 + $0xf4] ss:$8 sps:$4 sm:$0xff]  }
  0x18   :  { %890 = vmatpush1.bf16.msra.mxu1 %v2862_v11  ;;  %850 = vmatprep.subr.bf16.mxu0 %v2867_v12  ;;  %v2982_v31 = vld [vmem:[%s4020_s2 + $0x100] ss:$8 sps:$4 sm:$0xff]   ;;  %v2994_v33 = vld [vmem:[%s4020_s2 + $0x1f4] ss:$8 sps:$4 sm:$0xff]   ;;  %v2999_v34 = vld [vmem:[%s4020_s2 + $0xf0] ss:$8 sps:$4 sm:$0xff]  }
  0x19   :  { %891 = vmatprep.subr.bf16.mxu1 %v2874_v13  ;;  %v3004_v35 = vld [vmem:[%s4020_s2 + $0x1f0] ss:$8 sps:$4 sm:$0xff]   ;;  %v3011_v36 = vld [vmem:[%s4020_s2 + $0xe4] ss:$8 sps:$4 sm:$0xff]   ;;  %v3023_v38 = vld [vmem:[%s4020_s2 + $0xe0] ss:$8 sps:$4 sm:$0xff]  }
  0x1a   :  { %v3018_v37 = vld [vmem:[%s4020_s2 + $0x1e4] ss:$8 sps:$4 sm:$0xff]   ;;  %v3030_v39 = vld [vmem:[%s4020_s2 + $0x1e0] ss:$8 sps:$4 sm:$0xff]   ;;  %v3035_v40 = vld [vmem:[%s4020_s2 + $0xd4] ss:$8 sps:$4 sm:$0xff]  }
  0x1b   :  { %851 = vmatpush1.bf16.msra.mxu0 %v2879_v14  ;;  %v3042_v41 = vld [vmem:[%s4020_s2 + $0x1d4] ss:$8 sps:$4 sm:$0xff]   ;;  %v3047_v42 = vld [vmem:[%s4020_s2 + $0xd0] ss:$8 sps:$4 sm:$0xff]   ;;  %v3059_v44 = vld [vmem:[%s4020_s2 + $0xc4] ss:$8 sps:$4 sm:$0xff]  }
  0x1c   :  { %892 = vmatpush1.bf16.msra.mxu1 %v2886_v15  ;;  %852 = vmatprep.subr.bf16.mxu0 %v2891_v16  ;;  %v3052_v43 = vld [vmem:[%s4020_s2 + $0x1d0] ss:$8 sps:$4 sm:$0xff]   ;;  %v3066_v45 = vld [vmem:[%s4020_s2 + $0x1c4] ss:$8 sps:$4 sm:$0xff]   ;;  %v3074_v47 = vld [vmem:[%s4020_s2 + $0xc0] ss:$8 sps:$4 sm:$0xff]  }
  0x1d   :  { %893 = vmatprep.subr.bf16.mxu1 %v2898_v17  ;;  %v189_v46 = vld [vmem:[%s4018_s0 + $0x8] sm:$0xff]  ;;  %v191_v50 = vld [vmem:[%s4018_s0 + $0x18] sm:$0xff]  ;;  %v188_v4 = vld [vmem:[%s4018_s0] sm:$0xff]  ;;  %vm2755_vm0 = vmmov 0  }
  0x1e   :  { %v3079_v48 = vld [vmem:[%s4020_s2 + $0x1c0] ss:$8 sps:$4 sm:$0xff]   ;;  %v197_v49 = vpack.c.bf16 %v189_v46, %v189_v46  ;;  %v3089_v51 = vld [vmem:[%s4020_s2 + $0xb4] ss:$8 sps:$4 sm:$0xff]   ;;  %v199_v52 = vpack.c.bf16 %v191_v50, %v191_v50  ;;  %v3101_v54 = vld [vmem:[%s4020_s2 + $0xb0] ss:$8 sps:$4 sm:$0xff]   ;;  %v196_v46 = vpack.c.bf16 %v188_v4, %v188_v4 }
  0x1f   :  { %853 = vmatpush1.bf16.msra.mxu0 %v2903_v18  ;;  %v3096_v53 = vld [vmem:[%s4020_s2 + $0x1b4] ss:$8 sps:$4 sm:$0xff]   ;;  %v3106_v55 = vld [vmem:[%s4020_s2 + $0x1b0] ss:$8 sps:$4 sm:$0xff]   ;;  %v3113_v56 = vld [vmem:[%s4020_s2 + $0xa4] ss:$8 sps:$4 sm:$0xff]  }
  0x20   :  { %894 = vmatpush1.bf16.msra.mxu1 %v2908_v19  ;;  %854 = vmatprep.subr.bf16.mxu0 %v2915_v20  ;;  %v3120_v57 = vld [vmem:[%s4020_s2 + $0x1a4] ss:$8 sps:$4 sm:$0xff]   ;;  %v3125_v58 = vld [vmem:[%s4020_s2 + $0xa0] ss:$8 sps:$4 sm:$0xff]   ;;  %v3137_v60 = vld [vmem:[%s4020_s2 + $0x94] ss:$8 sps:$4 sm:$0xff]  }
  0x21   :  { %895 = vmatprep.subr.bf16.mxu1 %v2922_v21  ;;  %876 = vmatprep.mubr.bf16.mxu0 %v197_v49  ;;  %v3130_v59 = vld [vmem:[%s4020_s2 + $0x1a0] ss:$8 sps:$4 sm:$0xff]   ;;  %v3144_v61 = vld [vmem:[%s4020_s2 + $0x194] ss:$8 sps:$4 sm:$0xff]   ;;  %v3149_v62 = vld [vmem:[%s4020_s2 + $0x90] ss:$8 sps:$4 sm:$0xff]  }
  0x22   :  { %917 = vmatprep.mubr.bf16.mxu1 %v199_v52  ;;  %v3154_v63 = vld [vmem:[%s4020_s2 + $0x190] ss:$8 sps:$4 sm:$0xff]   ;;  %v3161_v0 = vld [vmem:[%s4020_s2 + $0x84] ss:$8 sps:$4 sm:$0xff]   ;;  %v3173_v2 = vld [vmem:[%s4020_s2 + $0x80] ss:$8 sps:$4 sm:$0xff]  }
  0x23   :  { %855 = vmatpush1.bf16.msra.mxu0 %v2927_v22  ;;  %4096 = vst [vmem:[#allocation6_spill] sm:$0xff] %v3161_v0  ;;  %v3168_v1 = vld [vmem:[%s4020_s2 + $0x184] ss:$8 sps:$4 sm:$0xff]   ;;  %4098 = vst [vmem:[#allocation8_spill] sm:$0xff] %v3173_v2  ;;  %v3178_v3 = vld [vmem:[%s4020_s2 + $0x180] ss:$8 sps:$4 sm:$0xff]  }
  0x24   :  { %896 = vmatpush1.bf16.msra.mxu1 %v2934_v23  ;;  %856 = vmatprep.subr.bf16.mxu0 %v2939_v24  ;;  %4097 = vst [vmem:[#allocation7_spill] sm:$0xff] %v3168_v1  ;;  %4099 = vst [vmem:[#allocation9_spill] sm:$0xff] %v3178_v3  ;;  %v190_v5 = vld [vmem:[%s4018_s0 + $0x10] sm:$0xff]  ;;  %v3222_v4 = vld [vmem:[%s4020_s2 + $0x364] ss:$8 sps:$4 sm:$0xff]  }
  0x25   :  { %897 = vmatprep.subr.bf16.mxu1 %v2946_v25  ;;  %v3191_v6 = vld [vmem:[%s4020_s2 + $0x274] ss:$8 sps:$4 sm:$0xff]   ;;  %v198_v49 = vpack.c.bf16 %v190_v5, %v190_v5  ;;  %v3203_v50 = vld [vmem:[%s4020_s2 + $0x270] ss:$8 sps:$4 sm:$0xff]   ;;  %4105 = vst [vmem:[#allocation15_spill] sm:$0xff] %v3222_v4 }
  0x26   :  { %4100 = vst [vmem:[#allocation10_spill] sm:$0xff] %v3191_v6  ;;  %v3198_v7 = vld [vmem:[%s4020_s2 + $0x374] ss:$8 sps:$4 sm:$0xff]   ;;  %4102 = vst [vmem:[#allocation12_spill] sm:$0xff] %v3203_v50  ;;  %v3208_v52 = vld [vmem:[%s4020_s2 + $0x370] ss:$8 sps:$4 sm:$0xff]  }
  0x27   :  { %857 = vmatpush1.bf16.msra.mxu0 %v2951_v26  ;;  %4101 = vst [vmem:[#allocation11_spill] sm:$0xff] %v3198_v7  ;;  %4103 = vst [vmem:[#allocation13_spill] sm:$0xff] %v3208_v52  ;;  %v3227_v5 = vld [vmem:[%s4020_s2 + $0x260] ss:$8 sps:$4 sm:$0xff]  }
  0x28   :  { %898 = vmatpush1.bf16.msra.mxu1 %v2956_v27  ;;  %858 = vmatprep.subr.bf16.mxu0 %v2963_v28  ;;  %4106 = vst [vmem:[#allocation16_spill] sm:$0xff] %v3227_v5 }
  0x29   :  { %899 = vmatprep.subr.bf16.mxu1 %v2970_v29 }
  0x2b   :  { %859 = vmatpush1.bf16.msra.mxu0 %v2975_v30 }
  0x2c   :  { %900 = vmatpush1.bf16.msra.mxu1 %v2982_v31  ;;  %860 = vmatprep.subr.bf16.mxu0 %v2987_v32 }
  0x2d   :  { %901 = vmatprep.subr.bf16.mxu1 %v2994_v33 }
  0x2f   :  { %861 = vmatpush2.bf16.msra.mxu0 %v2999_v34 }
  0x30   :  { %902 = vmatpush2.bf16.msra.mxu1 %v3004_v35  ;;  %862 = vmatprep.subr.bf16.mxu0 %v3011_v36 }
  0x31   :  { %903 = vmatprep.subr.bf16.mxu1 %v3018_v37 }
  0x33   :  { %863 = vmatpush2.bf16.msra.mxu0 %v3023_v38 }
  0x34   :  { %904 = vmatpush2.bf16.msra.mxu1 %v3030_v39  ;;  %864 = vmatprep.subr.bf16.mxu0 %v3035_v40 }
  0x35   :  { %905 = vmatprep.subr.bf16.mxu1 %v3042_v41 }
  0x37   :  { %865 = vmatpush2.bf16.msra.mxu0 %v3047_v42 }
  0x38   :  { %906 = vmatpush2.bf16.msra.mxu1 %v3052_v43  ;;  %866 = vmatprep.subr.bf16.mxu0 %v3059_v44 }
  0x39   :  { %907 = vmatprep.subr.bf16.mxu1 %v3066_v45 }
  0x3b   :  { %867 = vmatpush2.bf16.msra.mxu0 %v3074_v47 }
  0x3c   :  { %908 = vmatpush2.bf16.msra.mxu1 %v3079_v48  ;;  %868 = vmatprep.subr.bf16.mxu0 %v3089_v51 }
  0x3d   :  { %909 = vmatprep.subr.bf16.mxu1 %v3096_v53 }
  0x3f   :  { %869 = vmatpush2.bf16.msra.mxu0 %v3101_v54 }
  0x40   :  { %910 = vmatpush2.bf16.msra.mxu1 %v3106_v55  ;;  %870 = vmatprep.subr.bf16.mxu0 %v3113_v56 }
  0x41   :  { %911 = vmatprep.subr.bf16.mxu1 %v3120_v57 }
  0x43   :  { %871 = vmatpush2.bf16.msra.mxu0 %v3125_v58 }
  0x44   :  { %912 = vmatpush2.bf16.msra.mxu1 %v3130_v59  ;;  %872 = vmatprep.subr.bf16.mxu0 %v3137_v60 }
  0x45   :  { %913 = vmatprep.subr.bf16.mxu1 %v3144_v61 }
  0x47   :  { %873 = vmatpush2.bf16.msra.mxu0 %v3149_v62 }
  0x48   :  { %914 = vmatpush2.bf16.msra.mxu1 %v3154_v63  ;;  %874 = vmatprep.subr.bf16.mxu0 %v3161_v0  ;;  %v1018_v0 = vld [vmem:[%s4019_s1 + $0x18] sm:$0xff] }
  0x49   :  { %915 = vmatprep.subr.bf16.mxu1 %v3168_v1  ;;  %v3215_v1 = vld [vmem:[%s4020_s2 + $0x264] ss:$8 sps:$4 sm:$0xff]  }
  0x4a   :  { %4104 = vst [vmem:[#allocation14_spill] sm:$0xff] %v3215_v1 }
  0x4b   :  { %875 = vmatpush2.bf16.msra.mxu0 %v3173_v2  ;;  %v3382_v2 = vld [vmem:[%s4020_s2 + $0x300] ss:$8 sps:$4 sm:$0xff]  }
  0x4c   :  { %916 = vmatpush2.bf16.msra.mxu1 %v3178_v3  ;;  %926 = vmatprep.subr.bf16.mxu0 %v3191_v6  ;;  %v3232_v3 = vld [vmem:[%s4020_s2 + $0x360] ss:$8 sps:$4 sm:$0xff]   ;;  %4131 = vst [vmem:[#allocation41_spill] sm:$0xff] %v3382_v2 }
  0x4d   :  { %967 = vmatprep.subr.bf16.mxu1 %v3198_v7  ;;  %4107 = vst [vmem:[#allocation17_spill] sm:$0xff] %v3232_v3  ;;  %v3239_v7 = vld [vmem:[%s4020_s2 + $0x254] ss:$8 sps:$4 sm:$0xff]  }
  0x4e   :  { %877 = vmatmul.mubr.bf16.vlgmr.msra.gmra.mxu0 %v196_v46  ;;  %4108 = vst [vmem:[#allocation18_spill] sm:$0xff] %v3239_v7  ;;  %v3246_v46 = vld [vmem:[%s4020_s2 + $0x354] ss:$8 sps:$4 sm:$0xff]  }
  0x4f   :  { %918 = vmatmul.mubr.bf16.vlgmr.msra.gmra.mxu1 %v198_v49  ;;  %927 = vmatpush1.bf16.msra.mxu0 %v3203_v50  ;;  %4109 = vst [vmem:[#allocation19_spill] sm:$0xff] %v3246_v46  ;;  %v3251_v49 = vld [vmem:[%s4020_s2 + $0x250] ss:$8 sps:$4 sm:$0xff]  }
  0x50   :  { %968 = vmatpush1.bf16.msra.mxu1 %v3208_v52  ;;  %928 = vmatprep.subr.bf16.mxu0 %v3215_v1  ;;  %4110 = vst [vmem:[#allocation20_spill] sm:$0xff] %v3251_v49  ;;  %v3256_v52 = vld [vmem:[%s4020_s2 + $0x350] ss:$8 sps:$4 sm:$0xff]   ;;  %v3270_v1 = vld [vmem:[%s4020_s2 + $0x344] ss:$8 sps:$4 sm:$0xff]  }
  0x51   :  { %969 = vmatprep.subr.bf16.mxu1 %v3222_v4  ;;  %4111 = vst [vmem:[#allocation21_spill] sm:$0xff] %v3256_v52  ;;  %v3263_v4 = vld [vmem:[%s4020_s2 + $0x244] ss:$8 sps:$4 sm:$0xff]   ;;  %4113 = vst [vmem:[#allocation23_spill] sm:$0xff] %v3270_v1 }
  0x52   :  { %4112 = vst [vmem:[#allocation22_spill] sm:$0xff] %v3263_v4 }
  0x53   :  { %929 = vmatpush1.bf16.msra.mxu0 %v3227_v5  ;;  %v3275_v5 = vld [vmem:[%s4020_s2 + $0x240] ss:$8 sps:$4 sm:$0xff]  }
  0x54   :  { %970 = vmatpush1.bf16.msra.mxu1 %v3232_v3  ;;  %930 = vmatprep.subr.bf16.mxu0 %v3239_v7  ;;  %4114 = vst [vmem:[#allocation24_spill] sm:$0xff] %v3275_v5  ;;  %v3280_v3 = vld [vmem:[%s4020_s2 + $0x340] ss:$8 sps:$4 sm:$0xff]   ;;  %v3294_v7 = vld [vmem:[%s4020_s2 + $0x334] ss:$8 sps:$4 sm:$0xff]  }
  0x55   :  { %971 = vmatprep.subr.bf16.mxu1 %v3246_v46  ;;  %4115 = vst [vmem:[#allocation25_spill] sm:$0xff] %v3280_v3  ;;  %v3287_v46 = vld [vmem:[%s4020_s2 + $0x234] ss:$8 sps:$4 sm:$0xff]   ;;  %4117 = vst [vmem:[#allocation27_spill] sm:$0xff] %v3294_v7 }
  0x56   :  { %4116 = vst [vmem:[#allocation26_spill] sm:$0xff] %v3287_v46 }
  0x57   :  { %931 = vmatpush1.bf16.msra.mxu0 %v3251_v49  ;;  %v3299_v49 = vld [vmem:[%s4020_s2 + $0x230] ss:$8 sps:$4 sm:$0xff]  }
  0x58   :  { %972 = vmatpush1.bf16.msra.mxu1 %v3256_v52  ;;  %932 = vmatprep.subr.bf16.mxu0 %v3263_v4  ;;  %4118 = vst [vmem:[#allocation28_spill] sm:$0xff] %v3299_v49  ;;  %v3304_v52 = vld [vmem:[%s4020_s2 + $0x330] ss:$8 sps:$4 sm:$0xff]   ;;  %v3318_v4 = vld [vmem:[%s4020_s2 + $0x324] ss:$8 sps:$4 sm:$0xff]  }
  0x59   :  { %973 = vmatprep.subr.bf16.mxu1 %v3270_v1  ;;  %4119 = vst [vmem:[#allocation29_spill] sm:$0xff] %v3304_v52  ;;  %v3311_v1 = vld [vmem:[%s4020_s2 + $0x224] ss:$8 sps:$4 sm:$0xff]   ;;  %4121 = vst [vmem:[#allocation31_spill] sm:$0xff] %v3318_v4 }
  0x5a   :  { %4120 = vst [vmem:[#allocation30_spill] sm:$0xff] %v3311_v1 }
  0x5b   :  { %933 = vmatpush1.bf16.msra.mxu0 %v3275_v5  ;;  %v3323_v5 = vld [vmem:[%s4020_s2 + $0x220] ss:$8 sps:$4 sm:$0xff]  }
  0x5c   :  { %974 = vmatpush1.bf16.msra.mxu1 %v3280_v3  ;;  %934 = vmatprep.subr.bf16.mxu0 %v3287_v46  ;;  %4122 = vst [vmem:[#allocation32_spill] sm:$0xff] %v3323_v5  ;;  %v3328_v3 = vld [vmem:[%s4020_s2 + $0x320] ss:$8 sps:$4 sm:$0xff]   ;;  %v3342_v46 = vld [vmem:[%s4020_s2 + $0x314] ss:$8 sps:$4 sm:$0xff]  }
  0x5d   :  { %975 = vmatprep.subr.bf16.mxu1 %v3294_v7  ;;  %4123 = vst [vmem:[#allocation33_spill] sm:$0xff] %v3328_v3  ;;  %v3335_v7 = vld [vmem:[%s4020_s2 + $0x214] ss:$8 sps:$4 sm:$0xff]   ;;  %4125 = vst [vmem:[#allocation35_spill] sm:$0xff] %v3342_v46 }
  0x5e   :  { %4124 = vst [vmem:[#allocation34_spill] sm:$0xff] %v3335_v7 }
  0x5f   :  { %935 = vmatpush1.bf16.msra.mxu0 %v3299_v49  ;;  %v193_v49 = vld [vmem:[%s4018_s0 + $0x28] sm:$0xff] }
  0x60   :  { %976 = vmatpush1.bf16.msra.mxu1 %v3304_v52  ;;  %936 = vmatprep.subr.bf16.mxu0 %v3311_v1  ;;  %v201_v50 = vpack.c.bf16 %v193_v49, %v193_v49  ;;  %v195_v52 = vld [vmem:[%s4018_s0 + $0x38] sm:$0xff]  ;;  %v3365_v49 = vld [vmem:[%s4020_s2 + $0x204] ss:$8 sps:$4 sm:$0xff]  }
  0x61   :  { %977 = vmatprep.subr.bf16.mxu1 %v3318_v4  ;;  %v3355_v4 = vld [vmem:[%s4020_s2 + $0x210] ss:$8 sps:$4 sm:$0xff]   ;;  %4128 = vst [vmem:[#allocation38_spill] sm:$0xff] %v3365_v49  ;;  %v203_v6 = vpack.c.bf16 %v195_v52, %v195_v52  ;;  %v3387_v52 = vld [vmem:[%s4020_s2 + $0x2f4] ss:$8 sps:$4 sm:$0xff]  }
  0x62   :  { %4126 = vst [vmem:[#allocation36_spill] sm:$0xff] %v3355_v4  ;;  %v3360_v1 = vld [vmem:[%s4020_s2 + $0x310] ss:$8 sps:$4 sm:$0xff]   ;;  %958 = vmatprep.mubr.bf16.mxu0 %v201_v50  ;;  %4132 = vst [vmem:[#allocation42_spill] sm:$0xff] %v3387_v52 }
  0x63   :  { %937 = vmatpush1.bf16.msra.mxu0 %v3323_v5  ;;  %4127 = vst [vmem:[#allocation37_spill] sm:$0xff] %v3360_v1  ;;  %v3377_v5 = vld [vmem:[%s4020_s2 + $0x200] ss:$8 sps:$4 sm:$0xff]   ;;  %999 = vmatprep.mubr.bf16.mxu1 %v203_v6  ;;  %v3401_v6 = vld [vmem:[%s4020_s2 + $0x2f0] ss:$8 sps:$4 sm:$0xff]  }
  0x64   :  { %978 = vmatpush1.bf16.msra.mxu1 %v3328_v3  ;;  %938 = vmatprep.subr.bf16.mxu0 %v3335_v7  ;;  %v3372_v3 = vld [vmem:[%s4020_s2 + $0x304] ss:$8 sps:$4 sm:$0xff]   ;;  %4130 = vst [vmem:[#allocation40_spill] sm:$0xff] %v3377_v5  ;;  %4134 = vst [vmem:[#allocation44_spill] sm:$0xff] %v3401_v6  ;;  %v3406_v50 = vld [vmem:[%s4020_s2 + $0x3f0] ss:$8 sps:$4 sm:$0xff]  }
  0x65   :  { %979 = vmatprep.subr.bf16.mxu1 %v3342_v46  ;;  %4129 = vst [vmem:[#allocation39_spill] sm:$0xff] %v3372_v3  ;;  %v3392_v46 = vld [vmem:[%s4020_s2 + $0x3f4] ss:$8 sps:$4 sm:$0xff]   ;;  %4135 = vst [vmem:[#allocation45_spill] sm:$0xff] %v3406_v50  ;;  %v1016_v7 = vld [vmem:[%s4019_s1 + $0x8] sm:$0xff] }
  0x66   :  { %4133 = vst [vmem:[#allocation43_spill] sm:$0xff] %v3392_v46 }
  0x67   :  { %939 = vmatpush1.bf16.msra.mxu0 %v3355_v4  ;;  %v3411_v4 = vld [vmem:[%s4020_s2 + $0x2e4] ss:$8 sps:$4 sm:$0xff]  }
  0x68   :  { %980 = vmatpush1.bf16.msra.mxu1 %v3360_v1  ;;  %940 = vmatprep.subr.bf16.mxu0 %v3365_v49  ;;  %4136 = vst [vmem:[#allocation46_spill] sm:$0xff] %v3411_v4  ;;  %v3416_v49 = vld [vmem:[%s4020_s2 + $0x3e4] ss:$8 sps:$4 sm:$0xff]   ;;  %v3430_v1 = vld [vmem:[%s4020_s2 + $0x3e0] ss:$8 sps:$4 sm:$0xff]  }
  0x69   :  { %981 = vmatprep.subr.bf16.mxu1 %v3372_v3  ;;  %4137 = vst [vmem:[#allocation47_spill] sm:$0xff] %v3416_v49  ;;  %v3425_v3 = vld [vmem:[%s4020_s2 + $0x2e0] ss:$8 sps:$4 sm:$0xff]   ;;  %4139 = vst [vmem:[#allocation49_spill] sm:$0xff] %v3430_v1 }
  0x6a   :  { %4138 = vst [vmem:[#allocation48_spill] sm:$0xff] %v3425_v3 }
  0x6b   :  { %941 = vmatpush1.bf16.msra.mxu0 %v3377_v5  ;;  %v3435_v5 = vld [vmem:[%s4020_s2 + $0x2d4] ss:$8 sps:$4 sm:$0xff]  }
  0x6c   :  { %982 = vmatpush1.bf16.msra.mxu1 %v3382_v2  ;;  %942 = vmatprep.subr.bf16.mxu0 %v3387_v52  ;;  %4140 = vst [vmem:[#allocation50_spill] sm:$0xff] %v3435_v5  ;;  %v3440_v52 = vld [vmem:[%s4020_s2 + $0x3d4] ss:$8 sps:$4 sm:$0xff]   ;;  %v3454_v2 = vld [vmem:[%s4020_s2 + $0x3d0] ss:$8 sps:$4 sm:$0xff]  }
  0x6d   :  { %983 = vmatprep.subr.bf16.mxu1 %v3392_v46  ;;  %4141 = vst [vmem:[#allocation51_spill] sm:$0xff] %v3440_v52  ;;  %v3449_v46 = vld [vmem:[%s4020_s2 + $0x2d0] ss:$8 sps:$4 sm:$0xff]   ;;  %4143 = vst [vmem:[#allocation53_spill] sm:$0xff] %v3454_v2 }
  0x6e   :  { %4142 = vst [vmem:[#allocation52_spill] sm:$0xff] %v3449_v46 }
  0x6f   :  { %943 = vmatpush2.bf16.msra.mxu0 %v3401_v6  ;;  %v3459_v6 = vld [vmem:[%s4020_s2 + $0x2c4] ss:$8 sps:$4 sm:$0xff]  }
  0x70   :  { %984 = vmatpush2.bf16.msra.mxu1 %v3406_v50  ;;  %944 = vmatprep.subr.bf16.mxu0 %v3411_v4  ;;  %4144 = vst [vmem:[#allocation54_spill] sm:$0xff] %v3459_v6  ;;  %v3464_v4 = vld [vmem:[%s4020_s2 + $0x3c4] ss:$8 sps:$4 sm:$0xff]   ;;  %v3478_v50 = vld [vmem:[%s4020_s2 + $0x3c0] ss:$8 sps:$4 sm:$0xff]  }
  0x71   :  { %985 = vmatprep.subr.bf16.mxu1 %v3416_v49  ;;  %4145 = vst [vmem:[#allocation55_spill] sm:$0xff] %v3464_v4  ;;  %v3473_v49 = vld [vmem:[%s4020_s2 + $0x2c0] ss:$8 sps:$4 sm:$0xff]   ;;  %4147 = vst [vmem:[#allocation57_spill] sm:$0xff] %v3478_v50 }
  0x72   :  { %4146 = vst [vmem:[#allocation56_spill] sm:$0xff] %v3473_v49 }
  0x73   :  { %945 = vmatpush2.bf16.msra.mxu0 %v3425_v3  ;;  %v3483_v3 = vld [vmem:[%s4020_s2 + $0x2b4] ss:$8 sps:$4 sm:$0xff]  }
  0x74   :  { %986 = vmatpush2.bf16.msra.mxu1 %v3430_v1  ;;  %946 = vmatprep.subr.bf16.mxu0 %v3435_v5  ;;  %4148 = vst [vmem:[#allocation58_spill] sm:$0xff] %v3483_v3  ;;  %v3488_v5 = vld [vmem:[%s4020_s2 + $0x3b4] ss:$8 sps:$4 sm:$0xff]   ;;  %v3502_v1 = vld [vmem:[%s4020_s2 + $0x3b0] ss:$8 sps:$4 sm:$0xff]  }
  0x75   :  { %987 = vmatprep.subr.bf16.mxu1 %v3440_v52  ;;  %4149 = vst [vmem:[#allocation59_spill] sm:$0xff] %v3488_v5  ;;  %v3497_v52 = vld [vmem:[%s4020_s2 + $0x2b0] ss:$8 sps:$4 sm:$0xff]   ;;  %4151 = vst [vmem:[#allocation61_spill] sm:$0xff] %v3502_v1 }
  0x76   :  { %4150 = vst [vmem:[#allocation60_spill] sm:$0xff] %v3497_v52 }
  0x77   :  { %947 = vmatpush2.bf16.msra.mxu0 %v3449_v46  ;;  %v3507_v46 = vld [vmem:[%s4020_s2 + $0x2a4] ss:$8 sps:$4 sm:$0xff]  }
  0x78   :  { %988 = vmatpush2.bf16.msra.mxu1 %v3454_v2  ;;  %948 = vmatprep.subr.bf16.mxu0 %v3459_v6  ;;  %4152 = vst [vmem:[#allocation62_spill] sm:$0xff] %v3507_v46  ;;  %v3512_v6 = vld [vmem:[%s4020_s2 + $0x3a4] ss:$8 sps:$4 sm:$0xff]   ;;  %v3526_v2 = vld [vmem:[%s4020_s2 + $0x3a0] ss:$8 sps:$4 sm:$0xff]  }
  0x79   :  { %989 = vmatprep.subr.bf16.mxu1 %v3464_v4  ;;  %4153 = vst [vmem:[#allocation63_spill] sm:$0xff] %v3512_v6  ;;  %v3521_v4 = vld [vmem:[%s4020_s2 + $0x2a0] ss:$8 sps:$4 sm:$0xff]   ;;  %4155 = vst [vmem:[#allocation65_spill] sm:$0xff] %v3526_v2 }
  0x7a   :  { %4154 = vst [vmem:[#allocation64_spill] sm:$0xff] %v3521_v4 }
  0x7b   :  { %949 = vmatpush2.bf16.msra.mxu0 %v3473_v49  ;;  %v3531_v49 = vld [vmem:[%s4020_s2 + $0x294] ss:$8 sps:$4 sm:$0xff]  }
  0x7c   :  { %990 = vmatpush2.bf16.msra.mxu1 %v3478_v50  ;;  %950 = vmatprep.subr.bf16.mxu0 %v3483_v3  ;;  %4156 = vst [vmem:[#allocation66_spill] sm:$0xff] %v3531_v49  ;;  %v3536_v3 = vld [vmem:[%s4020_s2 + $0x394] ss:$8 sps:$4 sm:$0xff]   ;;  %v3550_v50 = vld [vmem:[%s4020_s2 + $0x390] ss:$8 sps:$4 sm:$0xff]  }
  0x7d   :  { %991 = vmatprep.subr.bf16.mxu1 %v3488_v5  ;;  %4157 = vst [vmem:[#allocation67_spill] sm:$0xff] %v3536_v3  ;;  %v3545_v5 = vld [vmem:[%s4020_s2 + $0x290] ss:$8 sps:$4 sm:$0xff]  }
  0x7f   :  { %951 = vmatpush2.bf16.msra.mxu0 %v3497_v52  ;;  %v3555_v52 = vld [vmem:[%s4020_s2 + $0x284] ss:$8 sps:$4 sm:$0xff]  }
  0x80   :  { %992 = vmatpush2.bf16.msra.mxu1 %v3502_v1  ;;  %952 = vmatprep.subr.bf16.mxu0 %v3507_v46  ;;  %4158 = vst [vmem:[#allocation68_spill] sm:$0xff] %v3555_v52  ;;  %v3560_v46 = vld [vmem:[%s4020_s2 + $0x384] ss:$8 sps:$4 sm:$0xff]   ;;  %v3574_v1 = vld [vmem:[%s4020_s2 + $0x380] ss:$8 sps:$4 sm:$0xff]  }
  0x81   :  { %993 = vmatprep.subr.bf16.mxu1 %v3512_v6  ;;  %4159 = vst [vmem:[#allocation69_spill] sm:$0xff] %v3560_v46  ;;  %v3569_v6 = vld [vmem:[%s4020_s2 + $0x280] ss:$8 sps:$4 sm:$0xff]   ;;  %4161 = vst [vmem:[#allocation71_spill] sm:$0xff] %v3574_v1 }
  0x82   :  { %4160 = vst [vmem:[#allocation70_spill] sm:$0xff] %v3569_v6 }
  0x83   :  { %953 = vmatpush2.bf16.msra.mxu0 %v3521_v4  ;;  %v192_v4 = vld [vmem:[%s4018_s0 + $0x20] sm:$0xff] }
  0x84   :  { %994 = vmatpush2.bf16.msra.mxu1 %v3526_v2  ;;  %954 = vmatprep.subr.bf16.mxu0 %v3531_v49  ;;  %v194_v49 = vld [vmem:[%s4018_s0 + $0x30] sm:$0xff] }
  0x85   :  { %995 = vmatprep.subr.bf16.mxu1 %v3536_v3  ;;  %v200_v3 = vpack.c.bf16 %v192_v4, %v192_v4  ;;  %v202_v2 = vpack.c.bf16 %v194_v49, %v194_v49  ;;  %v2722_v4 = vld [vmem:[%s4020_s2 + $0x174] ss:$8 sps:$4 sm:$0xff]   ;;  %v1024_v49 = vpack.c.bf16 %v1016_v7, %v1016_v7  ;;  %v4207_v7 = vld [vmem:[#allocation51_spill] sm:$0xff] }
  0x87   :  { %955 = vmatpush2.bf16.msra.mxu0 %v3545_v5 }
  0x88   :  { %996 = vmatpush2.bf16.msra.mxu1 %v3550_v50  ;;  %956 = vmatprep.subr.bf16.mxu0 %v3555_v52  ;;  %v2721_v52 = vld [vmem:[%s4020_s2 + $0x74] ss:$8 sps:$4 sm:$0xff]  }
  0x89   :  { %997 = vmatprep.subr.bf16.mxu1 %v3560_v46  ;;  %v1026_v46 = vpack.c.bf16 %v1018_v0, %v1018_v0  ;;  %v2726_v0 = vld [vmem:[%s4020_s2 + $0x164] ss:$8 sps:$4 sm:$0xff]  }
  0x8b   :  { %957 = vmatpush2.bf16.msra.mxu0 %v3569_v6  ;;  %v2723_v6 = vld [vmem:[%s4020_s2 + $0x70] ss:$8 sps:$4 sm:$0xff]  }
  0x8c   :  { %998 = vmatpush2.bf16.msra.mxu1 %v3574_v1  ;;  %1031 = vmatprep.subr.bf16.mxu0 %v2721_v52  ;;  %v2724_v1 = vld [vmem:[%s4020_s2 + $0x170] ss:$8 sps:$4 sm:$0xff]   ;;  %v2725_v52 = vld [vmem:[%s4020_s2 + $0x64] ss:$8 sps:$4 sm:$0xff]  }
  0x8d   :  { %1072 = vmatprep.subr.bf16.mxu1 %v2722_v4  ;;  %v4210_v4 = vld [vmem:[#allocation54_spill] sm:$0xff] }
  0x8e   :  { %959 = vmatmul.mubr.bf16.vlgmr.msra.gmra.mxu0 %v200_v3  ;;  %v4206_v3 = vld [vmem:[#allocation50_spill] sm:$0xff] }
  0x8f   :  { %1000 = vmatmul.mubr.bf16.vlgmr.msra.gmra.mxu1 %v202_v2  ;;  %1032 = vmatpush1.bf16.msra.mxu0 %v2723_v6  ;;  %v2727_v2 = vld [vmem:[%s4020_s2 + $0x60] ss:$8 sps:$4 sm:$0xff]   ;;  %v4209_v6 = vld [vmem:[#allocation53_spill] sm:$0xff] }
  0x90   :  { %1073 = vmatpush1.bf16.msra.mxu1 %v2724_v1  ;;  %1033 = vmatprep.subr.bf16.mxu0 %v2725_v52  ;;  %v2728_v1 = vld [vmem:[%s4020_s2 + $0x160] ss:$8 sps:$4 sm:$0xff]   ;;  %v4212_v52 = vld [vmem:[#allocation56_spill] sm:$0xff] }
  0x91   :  { %1074 = vmatprep.subr.bf16.mxu1 %v2726_v0  ;;  %1063 = vmatprep.mubr.bf16.mxu0 %v1024_v49  ;;  %v4211_v49 = vld [vmem:[#allocation55_spill] sm:$0xff]  ;;  %v4213_v0 = vld [vmem:[#allocation57_spill] sm:$0xff] }
  0x92   :  { %1104 = vmatprep.mubr.bf16.mxu1 %v1026_v46  ;;  %v4208_v46 = vld [vmem:[#allocation52_spill] sm:$0xff] }
  0x93   :  { %1034 = vmatpush1.bf16.msra.mxu0 %v2727_v2  ;;  %v4214_v2 = vld [vmem:[#allocation58_spill] sm:$0xff] }
  0x94   :  { %1075 = vmatpush1.bf16.msra.mxu1 %v2728_v1  ;;  %1035 = vmatprep.subr.bf16.mxu0 %v2847_v8  ;;  %v1015_v8 = vld [vmem:[%s4019_s1] sm:$0xff]  ;;  %v4215_v1 = vld [vmem:[#allocation59_spill] sm:$0xff] }
  0x95   :  { %1076 = vmatprep.subr.bf16.mxu1 %v2852_v9  ;;  %v1017_v9 = vld [vmem:[%s4019_s1 + $0x10] sm:$0xff] }
  0x97   :  { %1036 = vmatpush1.bf16.msra.mxu0 %v2857_v10  ;;  %v4162_v10 = vld [vmem:[#allocation6_spill] sm:$0xff] }
  0x98   :  { %1077 = vmatpush1.bf16.msra.mxu1 %v2862_v11  ;;  %1037 = vmatprep.subr.bf16.mxu0 %v2867_v12  ;;  %v4163_v11 = vld [vmem:[#allocation7_spill] sm:$0xff]  ;;  %v1023_v12 = vpack.c.bf16 %v1015_v8, %v1015_v8  ;;  %v4216_v8 = vld [vmem:[#allocation60_spill] sm:$0xff] }
  0x99   :  { %1078 = vmatprep.subr.bf16.mxu1 %v2874_v13  ;;  %v1025_v13 = vpack.c.bf16 %v1017_v9, %v1017_v9  ;;  %v4217_v9 = vld [vmem:[#allocation61_spill] sm:$0xff] }
  0x9b   :  { %1038 = vmatpush1.bf16.msra.mxu0 %v2879_v14  ;;  %v1020_v14 = vld [vmem:[%s4019_s1 + $0x28] sm:$0xff] }
  0x9c   :  { %1079 = vmatpush1.bf16.msra.mxu1 %v2886_v15  ;;  %1039 = vmatprep.subr.bf16.mxu0 %v2891_v16  ;;  %v1022_v15 = vld [vmem:[%s4019_s1 + $0x38] sm:$0xff]  ;;  %v4164_v16 = vld [vmem:[#allocation8_spill] sm:$0xff] }
  0x9d   :  { %1080 = vmatprep.subr.bf16.mxu1 %v2898_v17  ;;  %v4165_v17 = vld [vmem:[#allocation9_spill] sm:$0xff] }
  0x9f   :  { %1040 = vmatpush1.bf16.msra.mxu0 %v2903_v18  ;;  %v4166_v18 = vld [vmem:[#allocation10_spill] sm:$0xff] }
  0xa0   :  { %1081 = vmatpush1.bf16.msra.mxu1 %v2908_v19  ;;  %1041 = vmatprep.subr.bf16.mxu0 %v2915_v20  ;;  %v4167_v19 = vld [vmem:[#allocation11_spill] sm:$0xff]  ;;  %v1028_v20 = vpack.c.bf16 %v1020_v14, %v1020_v14  ;;  %v4222_v14 = vld [vmem:[#allocation66_spill] sm:$0xff] }
  0xa1   :  { %1082 = vmatprep.subr.bf16.mxu1 %v2922_v21  ;;  %v1030_v21 = vpack.c.bf16 %v1022_v15, %v1022_v15  ;;  %v4223_v15 = vld [vmem:[#allocation67_spill] sm:$0xff] }
  0xa3   :  { %1042 = vmatpush1.bf16.msra.mxu0 %v2927_v22  ;;  %v4168_v22 = vld [vmem:[#allocation12_spill] sm:$0xff] }
  0xa4   :  { %1083 = vmatpush1.bf16.msra.mxu1 %v2934_v23  ;;  %1043 = vmatprep.subr.bf16.mxu0 %v2939_v24  ;;  %v4169_v23 = vld [vmem:[#allocation13_spill] sm:$0xff]  ;;  %v4170_v24 = vld [vmem:[#allocation14_spill] sm:$0xff] }
  0xa5   :  { %1084 = vmatprep.subr.bf16.mxu1 %v2946_v25  ;;  %v4171_v25 = vld [vmem:[#allocation15_spill] sm:$0xff] }
  0xa7   :  { %1044 = vmatpush1.bf16.msra.mxu0 %v2951_v26  ;;  %v4172_v26 = vld [vmem:[#allocation16_spill] sm:$0xff] }
  0xa8   :  { %1085 = vmatpush1.bf16.msra.mxu1 %v2956_v27  ;;  %1045 = vmatprep.subr.bf16.mxu0 %v2963_v28  ;;  %v4173_v27 = vld [vmem:[#allocation17_spill] sm:$0xff]  ;;  %v4174_v28 = vld [vmem:[#allocation18_spill] sm:$0xff] }
  0xa9   :  { %1086 = vmatprep.subr.bf16.mxu1 %v2970_v29  ;;  %v4175_v29 = vld [vmem:[#allocation19_spill] sm:$0xff] }
  0xab   :  { %1046 = vmatpush1.bf16.msra.mxu0 %v2975_v30  ;;  %v4176_v30 = vld [vmem:[#allocation20_spill] sm:$0xff] }
  0xac   :  { %1087 = vmatpush1.bf16.msra.mxu1 %v2982_v31  ;;  %1047 = vmatprep.subr.bf16.mxu0 %v2987_v32  ;;  %v4177_v31 = vld [vmem:[#allocation21_spill] sm:$0xff]  ;;  %v4178_v32 = vld [vmem:[#allocation22_spill] sm:$0xff] }
  0xad   :  { %1088 = vmatprep.subr.bf16.mxu1 %v2994_v33  ;;  %v4179_v33 = vld [vmem:[#allocation23_spill] sm:$0xff] }
  0xaf   :  { %1048 = vmatpush2.bf16.msra.mxu0 %v2999_v34  ;;  %v4180_v34 = vld [vmem:[#allocation24_spill] sm:$0xff] }
  0xb0   :  { %1089 = vmatpush2.bf16.msra.mxu1 %v3004_v35  ;;  %1049 = vmatprep.subr.bf16.mxu0 %v3011_v36  ;;  %v4181_v35 = vld [vmem:[#allocation25_spill] sm:$0xff]  ;;  %v4182_v36 = vld [vmem:[#allocation26_spill] sm:$0xff] }
  0xb1   :  { %1090 = vmatprep.subr.bf16.mxu1 %v3018_v37  ;;  %v4183_v37 = vld [vmem:[#allocation27_spill] sm:$0xff] }
  0xb3   :  { %1050 = vmatpush2.bf16.msra.mxu0 %v3023_v38  ;;  %v4184_v38 = vld [vmem:[#allocation28_spill] sm:$0xff] }
  0xb4   :  { %1091 = vmatpush2.bf16.msra.mxu1 %v3030_v39  ;;  %1051 = vmatprep.subr.bf16.mxu0 %v3035_v40  ;;  %v4185_v39 = vld [vmem:[#allocation29_spill] sm:$0xff]  ;;  %v4186_v40 = vld [vmem:[#allocation30_spill] sm:$0xff] }
  0xb5   :  { %1092 = vmatprep.subr.bf16.mxu1 %v3042_v41  ;;  %v4187_v41 = vld [vmem:[#allocation31_spill] sm:$0xff] }
  0xb7   :  { %1052 = vmatpush2.bf16.msra.mxu0 %v3047_v42  ;;  %v4188_v42 = vld [vmem:[#allocation32_spill] sm:$0xff] }
  0xb8   :  { %1093 = vmatpush2.bf16.msra.mxu1 %v3052_v43  ;;  %1053 = vmatprep.subr.bf16.mxu0 %v3059_v44  ;;  %v4189_v43 = vld [vmem:[#allocation33_spill] sm:$0xff]  ;;  %v4190_v44 = vld [vmem:[#allocation34_spill] sm:$0xff] }
  0xb9   :  { %1094 = vmatprep.subr.bf16.mxu1 %v3066_v45  ;;  %v4191_v45 = vld [vmem:[#allocation35_spill] sm:$0xff] }
  0xbb   :  { %1054 = vmatpush2.bf16.msra.mxu0 %v3074_v47  ;;  %v4192_v47 = vld [vmem:[#allocation36_spill] sm:$0xff] }
  0xbc   :  { %1095 = vmatpush2.bf16.msra.mxu1 %v3079_v48  ;;  %1055 = vmatprep.subr.bf16.mxu0 %v3089_v51  ;;  %v4193_v48 = vld [vmem:[#allocation37_spill] sm:$0xff]  ;;  %v4194_v51 = vld [vmem:[#allocation38_spill] sm:$0xff] }
  0xbd   :  { %1096 = vmatprep.subr.bf16.mxu1 %v3096_v53  ;;  %v4195_v53 = vld [vmem:[#allocation39_spill] sm:$0xff] }
  0xbf   :  { %1056 = vmatpush2.bf16.msra.mxu0 %v3101_v54  ;;  %v4196_v54 = vld [vmem:[#allocation40_spill] sm:$0xff] }
  0xc0   :  { %1097 = vmatpush2.bf16.msra.mxu1 %v3106_v55  ;;  %1057 = vmatprep.subr.bf16.mxu0 %v3113_v56  ;;  %v4197_v55 = vld [vmem:[#allocation41_spill] sm:$0xff]  ;;  %v4198_v56 = vld [vmem:[#allocation42_spill] sm:$0xff] }
  0xc1   :  { %1098 = vmatprep.subr.bf16.mxu1 %v3120_v57  ;;  %v4199_v57 = vld [vmem:[#allocation43_spill] sm:$0xff] }
  0xc3   :  { %1058 = vmatpush2.bf16.msra.mxu0 %v3125_v58  ;;  %v4200_v58 = vld [vmem:[#allocation44_spill] sm:$0xff] }
  0xc4   :  { %1099 = vmatpush2.bf16.msra.mxu1 %v3130_v59  ;;  %1059 = vmatprep.subr.bf16.mxu0 %v3137_v60  ;;  %v4201_v59 = vld [vmem:[#allocation45_spill] sm:$0xff]  ;;  %v4202_v60 = vld [vmem:[#allocation46_spill] sm:$0xff] }
  0xc5   :  { %1100 = vmatprep.subr.bf16.mxu1 %v3144_v61  ;;  %v4203_v61 = vld [vmem:[#allocation47_spill] sm:$0xff] }
  0xc7   :  { %1060 = vmatpush2.bf16.msra.mxu0 %v3149_v62  ;;  %v4204_v62 = vld [vmem:[#allocation48_spill] sm:$0xff] }
  0xc8   :  { %1101 = vmatpush2.bf16.msra.mxu1 %v3154_v63  ;;  %1061 = vmatprep.subr.bf16.mxu0 %v4162_v10  ;;  %v4205_v63 = vld [vmem:[#allocation49_spill] sm:$0xff]  ;;  %v4218_v10 = vld [vmem:[#allocation62_spill] sm:$0xff] }
  0xc9   :  { %1102 = vmatprep.subr.bf16.mxu1 %v4163_v11  ;;  %v4219_v11 = vld [vmem:[#allocation63_spill] sm:$0xff] }
  0xcb   :  { %1062 = vmatpush2.bf16.msra.mxu0 %v4164_v16  ;;  %v1019_v16 = vld [vmem:[%s4019_s1 + $0x20] sm:$0xff] }
  0xcc   :  { %1103 = vmatpush2.bf16.msra.mxu1 %v4165_v17  ;;  %1113 = vmatprep.subr.bf16.mxu0 %v4166_v18  ;;  %v1021_v17 = vld [vmem:[%s4019_s1 + $0x30] sm:$0xff] }
  0xcd   :  { %1154 = vmatprep.subr.bf16.mxu1 %v4167_v19  ;;  %v4224_v18 = vld [vmem:[#allocation68_spill] sm:$0xff]  ;;  %v4225_v19 = vld [vmem:[#allocation69_spill] sm:$0xff] }
  0xce   :  { %1064 = vmatmul.mubr.bf16.vlgmr.msra.gmra.mxu0 %v1023_v12  ;;  %v4220_v12 = vld [vmem:[#allocation64_spill] sm:$0xff] }
  0xcf   :  { %1105 = vmatmul.mubr.bf16.vlgmr.msra.gmra.mxu1 %v1025_v13  ;;  %1114 = vmatpush1.bf16.msra.mxu0 %v4168_v22  ;;  %v4221_v13 = vld [vmem:[#allocation65_spill] sm:$0xff]  ;;  %v4226_v22 = vld [vmem:[#allocation70_spill] sm:$0xff] }
  0xd0   :  { %1155 = vmatpush1.bf16.msra.mxu1 %v4169_v23  ;;  %1115 = vmatprep.subr.bf16.mxu0 %v4170_v24  ;;  %v4227_v23 = vld [vmem:[#allocation71_spill] sm:$0xff] }
  0xd1   :  { %1156 = vmatprep.subr.bf16.mxu1 %v4171_v25  ;;  %1145 = vmatprep.mubr.bf16.mxu0 %v1028_v20  ;;  %v1027_v20 = vpack.c.bf16 %v1019_v16, %v1019_v16 }
  0xd2   :  { %1186 = vmatprep.mubr.bf16.mxu1 %v1030_v21  ;;  %v1029_v21 = vpack.c.bf16 %v1021_v17, %v1021_v17 }
  0xd3   :  { %1116 = vmatpush1.bf16.msra.mxu0 %v4172_v26 }
  0xd4   :  { %1157 = vmatpush1.bf16.msra.mxu1 %v4173_v27  ;;  %1117 = vmatprep.subr.bf16.mxu0 %v4174_v28 }
  0xd5   :  { %1158 = vmatprep.subr.bf16.mxu1 %v4175_v29 }
  0xd7   :  { %1118 = vmatpush1.bf16.msra.mxu0 %v4176_v30 }
  0xd8   :  { %1159 = vmatpush1.bf16.msra.mxu1 %v4177_v31  ;;  %1119 = vmatprep.subr.bf16.mxu0 %v4178_v32 }
  0xd9   :  { %1160 = vmatprep.subr.bf16.mxu1 %v4179_v33  ;;  %v2641_v33 = vld [vmem:[%s4021_s3 + $0x78] sm:$0xff]  }
  0xdb   :  { %1120 = vmatpush1.bf16.msra.mxu0 %v4180_v34  ;;  %v2642_v34 = vld [vmem:[%s4021_s3 + $0x38] sm:$0xff]  }
  0xdc   :  { %1161 = vmatpush1.bf16.msra.mxu1 %v4181_v35  ;;  %1121 = vmatprep.subr.bf16.mxu0 %v4182_v36  ;;  %v2643_v35 = vld [vmem:[%s4021_s3 + $0x70] sm:$0xff]  }
  0xdd   :  { %1162 = vmatprep.subr.bf16.mxu1 %v4183_v37  ;;  %v2644_v36 = vld [vmem:[%s4021_s3 + $0x30] sm:$0xff]   ;;  %v2645_v37 = vld [vmem:[%s4021_s3 + $0x68] sm:$0xff]  }
  0xdf   :  { %1122 = vmatpush1.bf16.msra.mxu0 %v4184_v38  ;;  %v2646_v38 = vld [vmem:[%s4021_s3 + $0x28] sm:$0xff]  }
  0xe0   :  { %1163 = vmatpush1.bf16.msra.mxu1 %v4185_v39  ;;  %1123 = vmatprep.subr.bf16.mxu0 %v4186_v40  ;;  %v2647_v39 = vld [vmem:[%s4021_s3 + $0x60] sm:$0xff]  }
  0xe1   :  { %1164 = vmatprep.subr.bf16.mxu1 %v4187_v41  ;;  %v2648_v40 = vld [vmem:[%s4021_s3 + $0x20] sm:$0xff]   ;;  %v2649_v41 = vld [vmem:[%s4021_s3 + $0x58] sm:$0xff]  }
  0xe3   :  { %1124 = vmatpush1.bf16.msra.mxu0 %v4188_v42  ;;  %v2650_v42 = vld [vmem:[%s4021_s3 + $0x18] sm:$0xff]  }
  0xe4   :  { %1165 = vmatpush1.bf16.msra.mxu1 %v4189_v43  ;;  %1125 = vmatprep.subr.bf16.mxu0 %v4190_v44 }
  0xe5   :  { %1166 = vmatprep.subr.bf16.mxu1 %v4191_v45  ;;  %v2651_v45 = vld [vmem:[%s4021_s3 + $0x50] sm:$0xff]  }
  0xe7   :  { %1126 = vmatpush1.bf16.msra.mxu0 %v4192_v47 }
  0xe8   :  { %1167 = vmatpush1.bf16.msra.mxu1 %v4193_v48  ;;  %1127 = vmatprep.subr.bf16.mxu0 %v4194_v51  ;;  %v2652_v48 = vld [vmem:[%s4021_s3 + $0x10] sm:$0xff]  }
  0xe9   :  { %1168 = vmatprep.subr.bf16.mxu1 %v4195_v53 }
  0xeb   :  { %1128 = vmatpush1.bf16.msra.mxu0 %v4196_v54 }
  0xec   :  { %1169 = vmatpush1.bf16.msra.mxu1 %v4197_v55  ;;  %1129 = vmatprep.subr.bf16.mxu0 %v4198_v56 }
  0xed   :  { %1170 = vmatprep.subr.bf16.mxu1 %v4199_v57 }
  0xef   :  { %1130 = vmatpush2.bf16.msra.mxu0 %v4200_v58  ;;  %v2653_v58 = vld [vmem:[%s4021_s3 + $0x48] sm:$0xff]  }
  0xf0   :  { %1171 = vmatpush2.bf16.msra.mxu1 %v4201_v59  ;;  %1131 = vmatprep.subr.bf16.mxu0 %v4202_v60  ;;  %v2654_v60 = vld [vmem:[%s4021_s3 + $0x8] sm:$0xff]  }
  0xf1   :  { %1172 = vmatprep.subr.bf16.mxu1 %v4203_v61 }
  0xf3   :  { %1132 = vmatpush2.bf16.msra.mxu0 %v4204_v62 }
  0xf4   :  { %1173 = vmatpush2.bf16.msra.mxu1 %v4205_v63  ;;  %1133 = vmatprep.subr.bf16.mxu0 %v4206_v3  ;;  %v2655_v63 = vld [vmem:[%s4021_s3 + $0x40] sm:$0xff]  }
  0xf5   :  { %1174 = vmatprep.subr.bf16.mxu1 %v4207_v7  ;;  %v2656_v3 = vld [vmem:[%s4021_s3] sm:$0xff]  }
  0xf7   :  { %1134 = vmatpush2.bf16.msra.mxu0 %v4208_v46 }
  0xf8   :  { %1175 = vmatpush2.bf16.msra.mxu1 %v4209_v6  ;;  %1135 = vmatprep.subr.bf16.mxu0 %v4210_v4 }
  0xf9   :  { %1176 = vmatprep.subr.bf16.mxu1 %v4211_v49 }
  0xfb   :  { %1136 = vmatpush2.bf16.msra.mxu0 %v4212_v52 }
  0xfc   :  { %1177 = vmatpush2.bf16.msra.mxu1 %v4213_v0  ;;  %1137 = vmatprep.subr.bf16.mxu0 %v4214_v2 }
  0xfd   :  { %1178 = vmatprep.subr.bf16.mxu1 %v4215_v1 }
  0xff   :  { %1138 = vmatpush2.bf16.msra.mxu0 %v4216_v8  ;;  %v1202_v8 = vlaneseq }
 0x100   :  { %1179 = vmatpush2.bf16.msra.mxu1 %v4217_v9  ;;  %1139 = vmatprep.subr.bf16.mxu0 %v4218_v10 }
 0x101   :  { %1180 = vmatprep.subr.bf16.mxu1 %v4219_v11  ;;  %v3806_v9 = vshrl.u32 %v1202_v8, 7  ;;  %v1211_v11 = vld [vmem:[%s4026_s8] ss:$8 sm:$0x3] }
 0x103   :  { %1140 = vmatpush2.bf16.msra.mxu0 %v4220_v12  ;;  %v1215_v10 = vsub.s32 0, %v3806_v9  ;;  %v1219_v12 = vsub.s32 1, %v3806_v9  ;;  %vm1204_vm1 = vcmp.lt.s32.totalorder %v3806_v9, 2 }
 0x104   :  { %1181 = vmatpush2.bf16.msra.mxu1 %v4221_v13  ;;  %1141 = vmatprep.subr.bf16.mxu0 %v4222_v14 }
 0x105   :  { %1182 = vmatprep.subr.bf16.mxu1 %v4223_v15  ;;  %v1216_v13 = vrot.slane %v1211_v11, %v1215_v10  ;;  %v1220_v16 = vrot.slane %v1211_v11, %v1219_v12 }
 0x107   :  { %1142 = vmatpush2.bf16.msra.mxu0 %v3545_v5  ;;  %v2754_v5 = vmov 0.0  }
 0x108   :  { %1183 = vmatpush2.bf16.msra.mxu1 %v3550_v50  ;;  %1143 = vmatprep.subr.bf16.mxu0 %v4224_v18 }
 0x109   :  { %1184 = vmatprep.subr.bf16.mxu1 %v4225_v19 }
 0x10b   :  { %1144 = vmatpush2.bf16.msra.mxu0 %v4226_v22 }
 0x10c   :  { %1185 = vmatpush2.bf16.msra.mxu1 %v4227_v23  ;;  %2310 = vmatprep.subr.bf16.mxu0 %v2641_v33 }
 0x10d   :  { %2381 = vmatprep.subr.bf16.mxu1 %v2754_v5 }
 0x10e   :  { %v878_v50 = vpop.f32.mrf.mxu0  ;;  %1146 = vmatmul.mubr.bf16.vlgmr.msra.gmra.mxu0 %v1027_v20 }
 0x10f   :  { %v919_v24 = vpop.f32.mrf.mxu1  ;;  %1187 = vmatmul.mubr.bf16.vlgmr.msra.gmra.mxu1 %v1029_v21  ;;  %2311 = vmatpush3.bf16.msra.mxu0 %v2642_v34 }
 0x110   :  { %v920_v25 = vadd.f32 %v919_v24, %v878_v50  ;;  %v880_v26 = vpop.f32.mrf.mxu0  ;;  %2312 = vmatprep.subr.bf16.mxu0 %v2643_v35  ;;  %2397 = vmatprep.mubr.msk.bf16.mxu1 %vm2755_vm0, %v2754_v5 }
 0x111   :  { %v921_v27 = vpop.f32.mrf.mxu1 }
 0x112   :  { %v922_v28 = vadd.f32 %v921_v27, %v880_v26  ;;  %v882_v29 = vpop.f32.mrf.mxu0 }
 0x113   :  { %v923_v30 = vpop.f32.mrf.mxu1  ;;  %2313 = vmatpush3.bf16.msra.mxu0 %v2644_v36 }
 0x114   :  { %v883_v31 = vpop.f32.mrf.mxu0  ;;  %2314 = vmatprep.subr.bf16.mxu0 %v2645_v37  ;;  %v2657_v37 = vld [vmem:[#allocation3 + $0x38] sm:$0xff]  }
 0x115   :  { %v924_v32 = vpop.f32.mrf.mxu1  ;;  %2382 = vmatpush3.bf16.msra.mxu1 %v2657_v37 }
 0x116   :  { %2383 = vmatprep.subr.bf16.mxu1 %v2754_v5 }
 0x117   :  { %2315 = vmatpush3.bf16.msra.mxu0 %v2646_v38  ;;  %v2658_v38 = vld [vmem:[#allocation3 + $0x30] sm:$0xff]  }
 0x118   :  { %2316 = vmatprep.subr.bf16.mxu0 %v2647_v39  ;;  %v2659_v39 = vld [vmem:[#allocation3 + $0x28] sm:$0xff]  }
 0x119   :  { %2384 = vmatpush3.bf16.msra.mxu1 %v2658_v38 }
 0x11a   :  { %2385 = vmatprep.subr.bf16.mxu1 %v2754_v5 }
 0x11b   :  { %2317 = vmatpush3.bf16.msra.mxu0 %v2648_v40  ;;  %v2660_v40 = vld [vmem:[#allocation3 + $0x20] sm:$0xff]  }
 0x11c   :  { %2318 = vmatprep.subr.bf16.mxu0 %v2649_v41  ;;  %v2661_v41 = vld [vmem:[#allocation3 + $0x18] sm:$0xff]  }
 0x11d   :  { %2386 = vmatpush3.bf16.msra.mxu1 %v2659_v39  ;;  %v1403_v39 = vld [vmem:[%s4026_s8 + $0x2] ss:$0 sm:$0xff] }
 0x11e   :  { %2387 = vmatprep.subr.bf16.mxu1 %v2754_v5 }
 0x11f   :  { %2319 = vmatpush3.bf16.msra.mxu0 %v2650_v42  ;;  %v2662_v42 = vld [vmem:[#allocation3 + $0x10] sm:$0xff]  }
 0x120   :  { %2320 = vmatprep.subr.bf16.mxu0 %v2651_v45  ;;  %v2665_v45 = vld [vmem:[%s4023_s5 + $0x38] sm:$0xff]  }
 0x121   :  { %2388 = vmatpush3.bf16.msra.mxu1 %v2660_v40 }
 0x122   :  { %2389 = vmatprep.subr.bf16.mxu1 %v2754_v5 }
 0x123   :  { %2321 = vmatpush3.bf16.msra.mxu0 %v2652_v48  ;;  %v2667_v48 = vld [vmem:[%s4023_s5 + $0x28] sm:$0xff]  }
 0x124   :  { %2322 = vmatprep.subr.bf16.mxu0 %v2653_v58 }
 0x125   :  { %2390 = vmatpush3.bf16.msra.mxu1 %v2661_v41 }
 0x126   :  { %2391 = vmatprep.subr.bf16.mxu1 %v2754_v5 }
 0x127   :  { %2323 = vmatpush3.bf16.msra.mxu0 %v2654_v60 }
 0x128   :  { %2324 = vmatprep.subr.bf16.mxu0 %v2655_v63 }
 0x129   :  { %2392 = vmatpush3.bf16.msra.mxu1 %v2662_v42 }
 0x12a   :  { %2393 = vmatprep.subr.bf16.mxu1 %v2754_v5 }
 0x12b   :  { %2325 = vmatpush3.bf16.msra.mxu0 %v2656_v3 }
 0x12c   :  { %2401 = vmatprep.subr.bf16.mxu0 %v2754_v5 }
 0x14e   :  { %v960_v43 = vpop.f32.mrf.mxu0 }
 0x14f   :  { %v1001_v44 = vpop.f32.mrf.mxu1  ;;  %v961_v47 = vadd.f32 %v960_v43, %v920_v25  ;;  %v2663_v43 = vld [vmem:[#allocation3 + $0x8] sm:$0xff]  }
 0x150   :  { %v962_v51 = vpop.f32.mrf.mxu0  ;;  %2394 = vmatpush3.bf16.msra.mxu1 %v2663_v43  ;;  %v1404_v43 = vld [vmem:[%s4026_s8 + $0x3] ss:$0 sm:$0xff] }
 0x151   :  { %v1003_v53 = vpop.f32.mrf.mxu1  ;;  %v1002_v54 = vadd.f32 %v1001_v44, %v961_v47  ;;  %v963_v55 = vadd.f32 %v962_v51, %v922_v28  ;;  %v2664_v44 = vld [vmem:[#allocation3] sm:$0xff]   ;;  %2395 = vmatprep.subr.bf16.mxu1 %v2754_v5  ;;  %v2666_v47 = vld [vmem:[%s4023_s5 + $0x30] sm:$0xff]  }
 0x152   :  { %v964_v56 = vpop.f32.mrf.mxu0  ;;  %v2668_v51 = vld [vmem:[%s4023_s5 + $0x20] sm:$0xff]  }
 0x153   :  { %v1005_v57 = vpop.f32.mrf.mxu1  ;;  %v1004_v59 = vadd.f32 %v1003_v53, %v963_v55  ;;  %v1223_v21 = vadd.f32 %v1216_v13, %v1002_v54  ;;  %v2669_v53 = vld [vmem:[%s4023_s5 + $0x18] sm:$0xff]   ;;  %v2670_v54 = vld [vmem:[%s4023_s5 + $0x10] sm:$0xff]   ;;  %v1265_v56 = vld [vmem:[%s4026_s8 + $0x1] ss:$0 sm:$0xff] }
 0x154   :  { %v965_v61 = vpop.f32.mrf.mxu0  ;;  %2396 = vmatpush3.bf16.msra.mxu1 %v2664_v44 }
 0x155   :  { %v1006_v62 = vpop.f32.mrf.mxu1  ;;  %v1224_v25 = vadd.f32 %v1220_v16, %v1004_v59  ;;  %v1227_v30 = vmax.f32 %v1223_v21, 0.0  ;;  %2421 = vmatprep.subr.bf16.mxu1 %v2754_v5  ;;  %v3860_v59 = vsel %vm1204_vm1, 1.0, %v2754_v5 }
 0x157   :  { %v1228_v33 = vmax.f32 %v1224_v25, 0.0 }
 0x18e   :  { %v1065_v7 = vpop.f32.mrf.mxu0 }
 0x18f   :  { %v1106_v46 = vpop.f32.mrf.mxu1 }
 0x190   :  { %v1107_v6 = vadd.f32 %v1106_v46, %v1065_v7  ;;  %v1067_v4 = vpop.f32.mrf.mxu0 }
 0x191   :  { %v1108_v49 = vpop.f32.mrf.mxu1 }
 0x192   :  { %v1069_v52 = vpop.f32.mrf.mxu0  ;;  %v1109_v17 = vadd.f32 %v1108_v49, %v1067_v4 }
 0x193   :  { %v1110_v0 = vpop.f32.mrf.mxu1 }
 0x194   :  { %v1070_v2 = vpop.f32.mrf.mxu0 }
 0x195   :  { %v1111_v1 = vpop.f32.mrf.mxu1 }
 0x1ce   :  { %v1147_v14 = vpop.f32.mrf.mxu0 }
 0x1cf   :  { %v1188_v15 = vpop.f32.mrf.mxu1  ;;  %v1148_v18 = vadd.f32 %v1147_v14, %v1107_v6 }
 0x1d0   :  { %v1149_v19 = vpop.f32.mrf.mxu0 }
 0x1d1   :  { %v1190_v20 = vpop.f32.mrf.mxu1  ;;  %v1189_v22 = vadd.f32 %v1188_v15, %v1148_v18  ;;  %v1150_v23 = vadd.f32 %v1149_v19, %v1109_v17 }
 0x1d2   :  { %v1151_v50 = vpop.f32.mrf.mxu0 }
 0x1d3   :  { %v1192_v24 = vpop.f32.mrf.mxu1  ;;  %v1225_v26 = vadd.f32 %v1216_v13, %v1189_v22  ;;  %v1191_v27 = vadd.f32 %v1190_v20, %v1150_v23 }
 0x1d4   :  { %v1152_v28 = vpop.f32.mrf.mxu0 }
 0x1d5   :  { %v1193_v29 = vpop.f32.mrf.mxu1  ;;  %v1229_v31 = vmax.f32 %v1225_v26, 0.0  ;;  %v1226_v32 = vadd.f32 %v1220_v16, %v1191_v27 }
 0x1d7   :  { %v3813_v34 = vpack.c.bf16 %v1229_v31, %v1227_v30  ;;  %v1230_v35 = vmax.f32 %v1226_v32, 0.0 }
 0x1d9   :  { %v3815_v36 = vpack.c.bf16 %v1230_v35, %v1228_v33 }
 0x1db   :  { %1394 = vmatprep.mubr.bf16.mxu0 %v3815_v36 }
 0x1dc   :  { %1395 = vmatmul.mubr.bf16.vlgmr.msra.gmra.mxu0 %v3813_v34 }
 0x1dd   :  { %2417 = vmatprep.mubr.msk.bf16.mxu0 %vm2755_vm0, %v2754_v5  ;;  %2402 = vmatpush3.bf16.msra.mxu0 %v2665_v45 }
 0x1de   :  { %2403 = vmatprep.subr.bf16.mxu0 %v2754_v5 }
 0x1e1   :  { %2404 = vmatpush3.bf16.msra.mxu0 %v2666_v47 }
 0x1e2   :  { %2405 = vmatprep.subr.bf16.mxu0 %v2754_v5 }
 0x1e5   :  { %2406 = vmatpush3.bf16.msra.mxu0 %v2667_v48 }
 0x1e6   :  { %2407 = vmatprep.subr.bf16.mxu0 %v2754_v5 }
 0x1e9   :  { %2408 = vmatpush3.bf16.msra.mxu0 %v2668_v51 }
 0x1ea   :  { %2409 = vmatprep.subr.bf16.mxu0 %v2754_v5 }
 0x1ed   :  { %2410 = vmatpush3.bf16.msra.mxu0 %v2669_v53 }
 0x1ee   :  { %2411 = vmatprep.subr.bf16.mxu0 %v2754_v5 }
 0x1f1   :  { %2412 = vmatpush3.bf16.msra.mxu0 %v2670_v54 }
 0x1f2   :  { %2413 = vmatprep.subr.bf16.mxu0 %v2754_v5 }
 0x29c   :  { %v2326_v55 = vpop.f32.mrf.mxu0 }
 0x29e   :  { %v2327_v57 = vpop.f32.mrf.mxu0 }
 0x29f   :  { %v2328_v58 = vadd.f32 %v2327_v57, %v2326_v55  ;;  %v2671_v55 = vld [vmem:[%s4023_s5 + $0x8] sm:$0xff]   ;;  %v2673_v57 = vld [vmem:[%s4025_s7 + $0x78] sm:$0xff]  }
 0x2a0   :  { %v2329_v60 = vpop.f32.mrf.mxu0  ;;  %2414 = vmatpush3.bf16.msra.mxu0 %v2671_v55 }
 0x2a1   :  { %v1397_v61 = vadd.f32 %v2328_v58, %v1265_v56  ;;  %2415 = vmatprep.subr.bf16.mxu0 %v2754_v5  ;;  %v1470_v58 = vld [vmem:[%s4026_s8 + $0x4] ss:$0 sm:$0xff] }
 0x2a2   :  { %v2330_v62 = vpop.f32.mrf.mxu0 }
 0x2a3   :  { %v1405_v63 = vmul.f32 %v3860_v59, %v1397_v61  ;;  %v2331_v3 = vadd.f32 %v2330_v62, %v2329_v60 }
 0x2a5   :  { %v1407_v7 = vrot.slane %v1405_v63, 4  ;;  %v1400_v46 = vadd.f32 %v2331_v3, %v1265_v56  ;;  %v2672_v56 = vld [vmem:[%s4023_s5] sm:$0xff]  }
 0x2a6   :  { %2416 = vmatpush3.bf16.msra.mxu0 %v2672_v56 }
 0x2a7   :  { %v1408_v6 = vadd.f32 %v1407_v7, %v1405_v63  ;;  %v1406_v4 = vmul.f32 %v3860_v59, %v1400_v46  ;;  %2359 = vmatprep.subr.bf16.mxu0 %v2673_v57 }
 0x2a9   :  { %v1409_v49 = vrot.slane %v1408_v6, 2  ;;  %v1413_v52 = vrot.slane %v1406_v4, 4 }
 0x2ab   :  { %v1410_v0 = vadd.f32 %v1409_v49, %v1408_v6  ;;  %v1414_v2 = vadd.f32 %v1413_v52, %v1406_v4  ;;  %v2675_v4 = vld [vmem:[%s4025_s7 + $0x70] sm:$0xff]   ;;  %v2677_v52 = vld [vmem:[%s4025_s7 + $0x68] sm:$0xff]  }
 0x2ac   :  { %v2676_v49 = vld [vmem:[%s4025_s7 + $0x30] sm:$0xff]  }
 0x2ad   :  { %v1411_v1 = vrot.slane %v1410_v0, 1  ;;  %v1415_v8 = vrot.slane %v1414_v2, 2 }
 0x2af   :  { %v1412_v9 = vadd.f32 %v1411_v1, %v1410_v0  ;;  %v1416_v10 = vadd.f32 %v1415_v8, %v1414_v2  ;;  %v2678_v0 = vld [vmem:[%s4025_s7 + $0x28] sm:$0xff]   ;;  %v2679_v2 = vld [vmem:[%s4025_s7 + $0x60] sm:$0xff]   ;;  %v2681_v1 = vld [vmem:[%s4025_s7 + $0x58] sm:$0xff]  }
 0x2b0   :  { %v2682_v8 = vld [vmem:[%s4025_s7 + $0x18] sm:$0xff]  }
 0x2b1   :  { %v1419_v11 = vmul.f32 0.5, %v1412_v9  ;;  %v1417_v12 = vrot.slane %v1416_v10, 1  ;;  %v2683_v9 = vld [vmem:[%s4025_s7 + $0x50] sm:$0xff]  }
 0x2b3   :  { %v1421_v13 = vsub.f32 %v1397_v61, %v1419_v11  ;;  %v1418_v14 = vadd.f32 %v1417_v12, %v1416_v10  ;;  %v2684_v10 = vld [vmem:[%s4025_s7 + $0x10] sm:$0xff]   ;;  %v2685_v11 = vld [vmem:[%s4025_s7 + $0x48] sm:$0xff]  }
 0x2b4   :  { %v2686_v12 = vld [vmem:[%s4025_s7 + $0x8] sm:$0xff]  }
 0x2b5   :  { %v1423_v15 = vmul.f32 %v3860_v59, %v1421_v13  ;;  %v1420_v16 = vmul.f32 0.5, %v1418_v14  ;;  %v2688_v14 = vld [vmem:[%s4025_s7] sm:$0xff]  }
 0x2b7   :  { %v1425_v17 = vmul.f32 %v1423_v15, %v1423_v15  ;;  %v1422_v18 = vsub.f32 %v1400_v46, %v1420_v16  ;;  %v2674_v46 = vld [vmem:[%s4025_s7 + $0x38] sm:$0xff]   ;;  %v2690_v16 = vld [vmem:[%s4024_s6 + $0x30] sm:$0xff]  }
 0x2b8   :  { %v2689_v15 = vld [vmem:[%s4024_s6 + $0x38] sm:$0xff]  }
 0x2b9   :  { %v1427_v19 = vrot.slane %v1425_v17, 4  ;;  %v1424_v20 = vmul.f32 %v3860_v59, %v1422_v18 }
 0x2bb   :  { %v1428_v21 = vadd.f32 %v1427_v19, %v1425_v17  ;;  %v1426_v22 = vmul.f32 %v1424_v20, %v1424_v20  ;;  %v2691_v17 = vld [vmem:[%s4024_s6 + $0x28] sm:$0xff]   ;;  %v2694_v19 = vld [vmem:[%s4024_s6 + $0x10] sm:$0xff]  }
 0x2bc   :  { %v2695_v20 = vld [vmem:[%s4024_s6 + $0x8] sm:$0xff]  }
 0x2bd   :  { %v1429_v23 = vrot.slane %v1428_v21, 2  ;;  %v1433_v50 = vrot.slane %v1426_v22, 4 }
 0x2bf   :  { %v1430_v24 = vadd.f32 %v1429_v23, %v1428_v21  ;;  %v1434_v25 = vadd.f32 %v1433_v50, %v1426_v22  ;;  %v2696_v21 = vld [vmem:[%s4024_s6] sm:$0xff]  }
 0x2c0   :  { %v1579_v22 = vld [vmem:[%s4026_s8 + $0x5] ss:$0 sm:$0xff] }
 0x2c1   :  { %v1431_v26 = vrot.slane %v1430_v24, 1  ;;  %v1435_v27 = vrot.slane %v1434_v25, 2 }
 0x2c3   :  { %v1432_v28 = vadd.f32 %v1431_v26, %v1430_v24  ;;  %v1436_v29 = vadd.f32 %v1435_v27, %v1434_v25 }
 0x2c5   :  { %v1439_v30 = vmul.f32 0.5, %v1432_v28  ;;  %v1437_v31 = vrot.slane %v1436_v29, 1 }
 0x2c7   :  { %v1441_v32 = vadd.f32 1e-05, %v1439_v30  ;;  %v1438_v33 = vadd.f32 %v1437_v31, %v1436_v29 }
 0x2c9   :  { %2697 = vrsqrt.f32 %v1441_v32  ;;  %v1440_v35 = vmul.f32 0.5, %v1438_v33 }
 0x2cb   :  { %v1442_v37 = vadd.f32 1e-05, %v1440_v35 }
 0x2cd   :  { %2699 = vrsqrt.f32 %v1442_v37 }
 0x2d6   :  { %v2698_v38 = vpop.eup %2697 }
 0x2d7   :  { %v1445_v40 = vmul.f32 %v2698_v38, %v1421_v13  ;;  %v2687_v13 = vld [vmem:[%s4025_s7 + $0x40] sm:$0xff]  }
 0x2d9   :  { %v1447_v41 = vmul.f32 %v1445_v40, %v1403_v39 }
 0x2da   :  { %v2700_v42 = vpop.eup %2699 }
 0x2db   :  { %v1446_v44 = vmul.f32 %v2700_v42, %v1422_v18  ;;  %v1449_v47 = vadd.f32 %v1447_v41, %v1404_v43  ;;  %v2693_v18 = vld [vmem:[%s4024_s6 + $0x18] sm:$0xff]  }
 0x2dd   :  { %v1448_v45 = vmul.f32 %v1446_v44, %v1403_v39  ;;  %v1451_v51 = vmax.f32 %v1449_v47, 0.0 }
 0x2df   :  { %v1450_v48 = vadd.f32 %v1448_v45, %v1404_v43 }
 0x2e1   :  { %v1452_v53 = vmax.f32 %v1450_v48, 0.0 }
 0x2e3   :  { %v1453_v54 = vpack.c.bf16 %v1452_v53, %v1451_v51 }
 0x2e5   :  { %2398 = vmatmul.mubr.bf16.vlgmr.msra.gmra.mxu1 %v1453_v54 }
 0x2e6   :  { %2437 = vmatprep.mubr.msk.bf16.mxu1 %vm2755_vm0, %v2754_v5  ;;  %2422 = vmatpush3.bf16.msra.mxu1 %v2689_v15 }
 0x2e7   :  { %2423 = vmatprep.subr.bf16.mxu1 %v2754_v5 }
 0x2ea   :  { %2424 = vmatpush3.bf16.msra.mxu1 %v2690_v16 }
 0x2eb   :  { %2425 = vmatprep.subr.bf16.mxu1 %v2754_v5 }
 0x2ee   :  { %2426 = vmatpush3.bf16.msra.mxu1 %v2691_v17 }
 0x2ef   :  { %2427 = vmatprep.subr.bf16.mxu1 %v2754_v5 }
 0x3a5   :  { %v1553_v60 = vpop.f32.mrf.mxu1 }
 0x3a6   :  { %v1554_v61 = vadd.f32 %v1553_v60, %v1470_v58 }
 0x3a7   :  { %v2399_v62 = vpop.f32.mrf.mxu1 }
 0x3a8   :  { %1560 = vst [vmem:[%s4027_s9] sm:$0xff] %v1554_v61 }
 0x3a9   :  { %v1556_v63 = vpop.f32.mrf.mxu1 }
 0x3aa   :  { %v1557_v3 = vadd.f32 %v1556_v63, %v1470_v58 }
 0x3ab   :  { %v2400_v7 = vpop.f32.mrf.mxu1 }
 0x3ac   :  { %1561 = vst [vmem:[%s4027_s9 + $0x8] sm:$0xff] %v1557_v3  ;;  %v1562_v6 = vpack.c.bf16 %v1557_v3, %v1554_v61  ;;  %v1872_v7 = vld [vmem:[%s4026_s8 + $0x11] ss:$0 sm:$0xff] }
 0x3ae   :  { %2418 = vmatmul.mubr.bf16.vlgmr.msra.gmra.mxu0 %v1562_v6 }
 0x3af   :  { %2360 = vmatpush3.bf16.msra.mxu0 %v2674_v46  ;;  %2001 = vmatprep.mubr.bf16.mxu0 %v3815_v36  ;;  %v2680_v36 = vld [vmem:[%s4025_s7 + $0x20] sm:$0xff]  }
 0x3b0   :  { %2361 = vmatprep.subr.bf16.mxu0 %v2675_v4 }
 0x3b3   :  { %2362 = vmatpush3.bf16.msra.mxu0 %v2676_v49 }
 0x3b4   :  { %2363 = vmatprep.subr.bf16.mxu0 %v2677_v52 }
 0x3b7   :  { %2364 = vmatpush3.bf16.msra.mxu0 %v2678_v0 }
 0x3b8   :  { %2365 = vmatprep.subr.bf16.mxu0 %v2679_v2 }
 0x3bb   :  { %2366 = vmatpush3.bf16.msra.mxu0 %v2680_v36 }
 0x3bc   :  { %2367 = vmatprep.subr.bf16.mxu0 %v2681_v1 }
 0x3bf   :  { %2368 = vmatpush3.bf16.msra.mxu0 %v2682_v8 }
 0x3c0   :  { %2369 = vmatprep.subr.bf16.mxu0 %v2683_v9 }
 0x3c3   :  { %2370 = vmatpush3.bf16.msra.mxu0 %v2684_v10 }
 0x3c4   :  { %2371 = vmatprep.subr.bf16.mxu0 %v2685_v11 }
 0x3c7   :  { %2372 = vmatpush3.bf16.msra.mxu0 %v2686_v12 }
 0x3c8   :  { %2373 = vmatprep.subr.bf16.mxu0 %v2687_v13 }
 0x3cb   :  { %2374 = vmatpush3.bf16.msra.mxu0 %v2688_v14 }
 0x3ce   :  { %2002 = vmatmul.mubr.bf16.vlgmr.msra.gmra.mxu0 %v3813_v34  ;;  %v2692_v34 = vld [vmem:[%s4024_s6 + $0x20] sm:$0xff]  }
 0x3cf   :  { %2428 = vmatpush3.bf16.msra.mxu1 %v2692_v34 }
 0x3d0   :  { %2429 = vmatprep.subr.bf16.mxu1 %v2754_v5 }
 0x3d3   :  { %2430 = vmatpush3.bf16.msra.mxu1 %v2693_v18 }
 0x3d4   :  { %2431 = vmatprep.subr.bf16.mxu1 %v2754_v5 }
 0x3d7   :  { %2432 = vmatpush3.bf16.msra.mxu1 %v2694_v19 }
 0x3d8   :  { %2433 = vmatprep.subr.bf16.mxu1 %v2754_v5 }
 0x3db   :  { %2434 = vmatpush3.bf16.msra.mxu1 %v2695_v20 }
 0x3dc   :  { %2435 = vmatprep.subr.bf16.mxu1 %v2754_v5 }
 0x3df   :  { %2436 = vmatpush3.bf16.msra.mxu1 %v2696_v21 }
 0x46e   :  { %v1662_v23 = vpop.f32.mrf.mxu0 }
 0x46f   :  { %v1663_v50 = vadd.f32 %v1662_v23, %v1579_v22 }
 0x470   :  { %v2419_v24 = vpop.f32.mrf.mxu0 }
 0x471   :  { %v1671_v25 = vmul.f32 %v3860_v59, %v1663_v50 }
 0x472   :  { %v1665_v26 = vpop.f32.mrf.mxu0 }
 0x473   :  { %v1673_v27 = vrot.slane %v1671_v25, 4  ;;  %v1666_v28 = vadd.f32 %v1665_v26, %v1579_v22 }
 0x474   :  { %v2420_v29 = vpop.f32.mrf.mxu0 }
 0x475   :  { %v1674_v30 = vadd.f32 %v1673_v27, %v1671_v25  ;;  %v1672_v5 = vmul.f32 %v3860_v59, %v1666_v28  ;;  %v1669_v27 = vld [vmem:[%s4026_s8 + $0x6] ss:$0 sm:$0xff] }
 0x477   :  { %v1675_v31 = vrot.slane %v1674_v30, 2  ;;  %v1679_v32 = vrot.slane %v1672_v5, 4 }
 0x479   :  { %v1676_v33 = vadd.f32 %v1675_v31, %v1674_v30  ;;  %v1680_v35 = vadd.f32 %v1679_v32, %v1672_v5 }
 0x47b   :  { %v1677_v37 = vrot.slane %v1676_v33, 1  ;;  %v1681_v38 = vrot.slane %v1680_v35, 2 }
 0x47d   :  { %v1678_v39 = vadd.f32 %v1677_v37, %v1676_v33  ;;  %v1682_v40 = vadd.f32 %v1681_v38, %v1680_v35  ;;  %v1670_v35 = vld [vmem:[%s4026_s8 + $0x7] ss:$0 sm:$0xff] }
 0x47f   :  { %v1685_v41 = vmul.f32 0.5, %v1678_v39  ;;  %v1683_v42 = vrot.slane %v1682_v40, 1 }
 0x481   :  { %v1687_v43 = vsub.f32 %v1663_v50, %v1685_v41  ;;  %v1684_v44 = vadd.f32 %v1683_v42, %v1682_v40 }
 0x483   :  { %v1689_v45 = vmul.f32 %v3860_v59, %v1687_v43  ;;  %v1686_v47 = vmul.f32 0.5, %v1684_v44 }
 0x485   :  { %v1691_v48 = vmul.f32 %v1689_v45, %v1689_v45  ;;  %v1688_v51 = vsub.f32 %v1666_v28, %v1686_v47 }
 0x487   :  { %v1693_v53 = vrot.slane %v1691_v48, 4  ;;  %v1690_v54 = vmul.f32 %v3860_v59, %v1688_v51 }
 0x489   :  { %v1694_v55 = vadd.f32 %v1693_v53, %v1691_v48  ;;  %v1692_v56 = vmul.f32 %v1690_v54, %v1690_v54 }
 0x48b   :  { %v1695_v57 = vrot.slane %v1694_v55, 2  ;;  %v1699_v58 = vrot.slane %v1692_v56, 4 }
 0x48d   :  { %v1696_v60 = vadd.f32 %v1695_v57, %v1694_v55  ;;  %v1700_v61 = vadd.f32 %v1699_v58, %v1692_v56 }
 0x48e   :  { %v2375_v62 = vpop.f32.mrf.mxu0 }
 0x48f   :  { %v1697_v63 = vrot.slane %v1696_v60, 1  ;;  %v1701_v3 = vrot.slane %v1700_v61, 2 }
 0x490   :  { %v2376_v46 = vpop.f32.mrf.mxu0 }
 0x491   :  { %v1698_v6 = vadd.f32 %v1697_v63, %v1696_v60  ;;  %v1702_v4 = vadd.f32 %v1701_v3, %v1700_v61  ;;  %v2377_v49 = vadd.f32 %v2376_v46, %v2375_v62 }
 0x492   :  { %v2378_v52 = vpop.f32.mrf.mxu0 }
 0x493   :  { %v1705_v0 = vmul.f32 0.5, %v1698_v6  ;;  %v1703_v2 = vrot.slane %v1702_v4, 1  ;;  %v2004_v36 = vadd.f32 %v2377_v49, %v1872_v7  ;;  %v2010_v49 = vld [vmem:[%s4026_s8 + $0x12] ss:$0 sm:$0xff] }
 0x494   :  { %v2379_v1 = vpop.f32.mrf.mxu0 }
 0x495   :  { %v1707_v8 = vadd.f32 1e-05, %v1705_v0  ;;  %v1704_v9 = vadd.f32 %v1703_v2, %v1702_v4  ;;  %v2012_v10 = vmul.f32 %v3860_v59, %v2004_v36  ;;  %v2380_v11 = vadd.f32 %v2379_v1, %v2378_v52  ;;  %v2011_v0 = vld [vmem:[%s4026_s8 + $0x13] ss:$0 sm:$0xff] }
 0x497   :  { %2701 = vrsqrt.f32 %v1707_v8  ;;  %v1706_v12 = vmul.f32 0.5, %v1704_v9  ;;  %v2014_v13 = vrot.slane %v2012_v10, 4  ;;  %v2007_v14 = vadd.f32 %v2380_v11, %v1872_v7  ;;  %v2060_v9 = vld [vmem:[%s4026_s8 + $0x14] ss:$0 sm:$0xff] }
 0x499   :  { %v1708_v15 = vadd.f32 1e-05, %v1706_v12  ;;  %v2015_v16 = vadd.f32 %v2014_v13, %v2012_v10  ;;  %v2013_v17 = vmul.f32 %v3860_v59, %v2007_v14 }
 0x49b   :  { %2703 = vrsqrt.f32 %v1708_v15  ;;  %v2016_v34 = vrot.slane %v2015_v16, 2  ;;  %v2020_v18 = vrot.slane %v2013_v17, 4 }
 0x49d   :  { %v2017_v19 = vadd.f32 %v2016_v34, %v2015_v16  ;;  %v2021_v20 = vadd.f32 %v2020_v18, %v2013_v17  ;;  %v2756_v16 = vmov 0   ;;  %v2067_v17 = vld [vmem:[%s4026_s8 + $0x15] ss:$0 sm:$0xff] }
 0x49e   :  { %2447 = vset.pattern.permute.xlu0 %v2756_v16  ;;  %2448 = vset.pattern.permute.xlu1 %v2756_v16 }
 0x49f   :  { %v2018_v21 = vrot.slane %v2017_v19, 1  ;;  %v2022_v22 = vrot.slane %v2021_v20, 2 }
 0x4a1   :  { %v2019_v23 = vadd.f32 %v2018_v21, %v2017_v19  ;;  %v2023_v50 = vadd.f32 %v2022_v22, %v2021_v20 }
 0x4a3   :  { %v2026_v24 = vmul.f32 0.5, %v2019_v23  ;;  %v2024_v25 = vrot.slane %v2023_v50, 1 }
 0x4a4   :  { %v2702_v26 = vpop.eup %2701 }
 0x4a5   :  { %v1711_v28 = vmul.f32 %v2702_v26, %v1687_v43  ;;  %v2028_v29 = vsub.f32 %v2004_v36, %v2026_v24  ;;  %v2025_v30 = vadd.f32 %v2024_v25, %v2023_v50  ;;  %v1736_v25 = vld [vmem:[%s4026_s8 + $0x10] ss:$0 sm:$0xff] }
 0x4a7   :  { %v1713_v5 = vmul.f32 %v1711_v28, %v1669_v27  ;;  %v2030_v31 = vmul.f32 %v3860_v59, %v2028_v29  ;;  %v2027_v32 = vmul.f32 0.5, %v2025_v30 }
 0x4a8   :  { %v2704_v33 = vpop.eup %2703 }
 0x4a9   :  { %v1712_v37 = vmul.f32 %v2704_v33, %v1688_v51  ;;  %v2032_v38 = vmul.f32 %v2030_v31, %v2030_v31  ;;  %v2029_v39 = vsub.f32 %v2007_v14, %v2027_v32  ;;  %v1715_v40 = vadd.f32 %v1713_v5, %v1670_v35 }
 0x4ab   :  { %v1714_v41 = vmul.f32 %v1712_v37, %v1669_v27  ;;  %v2034_v42 = vrot.slane %v2032_v38, 4  ;;  %v2031_v44 = vmul.f32 %v3860_v59, %v2029_v39  ;;  %v1717_v48 = vmax.f32 %v1715_v40, 0.0 }
 0x4ad   :  { %v1716_v43 = vadd.f32 %v1714_v41, %v1670_v35  ;;  %v2035_v45 = vadd.f32 %v2034_v42, %v2032_v38  ;;  %v2033_v47 = vmul.f32 %v2031_v44, %v2031_v44 }
 0x4af   :  { %v1718_v53 = vmax.f32 %v1716_v43, 0.0  ;;  %v2036_v54 = vrot.slane %v2035_v45, 2  ;;  %v2040_v55 = vrot.slane %v2033_v47, 4 }
 0x4b1   :  { %v2037_v56 = vadd.f32 %v2036_v54, %v2035_v45  ;;  %v2041_v57 = vadd.f32 %v2040_v55, %v2033_v47  ;;  %v1719_v58 = vpack.c.bf16 %v1718_v53, %v1717_v48 }
 0x4b3   :  { %v2038_v60 = vrot.slane %v2037_v56, 1  ;;  %v2042_v61 = vrot.slane %v2041_v57, 2  ;;  %2438 = vmatmul.mubr.bf16.vlgmr.msra.gmra.mxu1 %v1719_v58 }
 0x4b5   :  { %v2039_v51 = vadd.f32 %v2038_v60, %v2037_v56  ;;  %v2043_v62 = vadd.f32 %v2042_v61, %v2041_v57 }
 0x4b7   :  { %v2046_v63 = vmul.f32 0.5, %v2039_v51  ;;  %v2044_v3 = vrot.slane %v2043_v62, 1 }
 0x4b9   :  { %v2048_v7 = vadd.f32 1e-05, %v2046_v63  ;;  %v2045_v46 = vadd.f32 %v2044_v3, %v2043_v62 }
 0x4bb   :  { %2705 = vrsqrt.f32 %v2048_v7  ;;  %v2047_v59 = vmul.f32 0.5, %v2045_v46 }
 0x4bd   :  { %v2049_v6 = vadd.f32 1e-05, %v2047_v59 }
 0x4bf   :  { %2707 = vrsqrt.f32 %v2049_v6 }
 0x4c8   :  { %v2706_v4 = vpop.eup %2705 }
 0x4c9   :  { %v2052_v52 = vmul.f32 %v2706_v4, %v2028_v29 }
 0x4cb   :  { %v2054_v2 = vmul.f32 %v2052_v52, %v2010_v49 }
 0x4cc   :  { %v2708_v36 = vpop.eup %2707 }
 0x4cd   :  { %v2053_v1 = vmul.f32 %v2708_v36, %v2029_v39  ;;  %v2056_v8 = vadd.f32 %v2054_v2, %v2011_v0 }
 0x4cf   :  { %v2058_v10 = vmax.f32 %v2056_v8, 0.0  ;;  %v2055_v11 = vmul.f32 %v2053_v1, %v2010_v49 }
 0x4d1   :  { %v2061_v12 = vmul.f32 %v2060_v9, %v2058_v10  ;;  %v2057_v13 = vadd.f32 %v2055_v11, %v2011_v0 }
 0x4d3   :  { %2063 = vadd.xlane.f32.xlu0 %v2061_v12  ;;  %v2059_v14 = vmax.f32 %v2057_v13, 0.0 }
 0x4d5   :  { %v2062_v15 = vmul.f32 %v2060_v9, %v2059_v14 }
 0x4d7   :  { %2065 = vadd.xlane.f32.xlu0 %v2062_v15 }
 0x55c   :  { %v2064_v34 = vpop.xlane.xlu0 %2063 }
 0x55d   :  { %v2068_v18 = vadd.f32 %v2067_v17, %v2064_v34 }
 0x55f   :  { %v2072_v19 = vmin.f32 %v2068_v18, 20.0  ;;  %vm2070_vm3 = vcmp.gt.f32.partialorder %v2068_v18, 20.0 }
 0x560   :  { %v2066_v20 = vpop.xlane.xlu0 %2065 }
 0x561   :  { %v2074_v21 = vmul.f32 1.442695, %v2072_v19  ;;  %v2069_v22 = vadd.f32 %v2067_v17, %v2066_v20 }
 0x563   :  { %2709 = vpow2.f32 %v2074_v21  ;;  %v2073_v23 = vmin.f32 %v2069_v22, 20.0  ;;  %vm2071_vm5 = vcmp.gt.f32.partialorder %v2069_v22, 20.0 }
 0x565   :  { %v2076_v50 = vmul.f32 1.442695, %v2073_v23 }
 0x567   :  { %2711 = vpow2.f32 %v2076_v50 }
 0x570   :  { %v2710_v24 = vpop.eup %2709 }
 0x571   :  { %v2078_v26 = vadd.f32 1.0, %v2710_v24  ;;  %v2081_v37 = vmul.f32 -0.5, %v2710_v24  ;;  %v2084_v41 = vand.u32 2147483647, %v2710_v24 }
 0x573   :  { %v1819_v27 = vpop.f32.mrf.mxu1  ;;  %2713 = vlog2.f32 %v2078_v26  ;;  %v2082_v39 = vadd.f32 1.0, %v2081_v37  ;;  %vm2085_vm2 = vcmp.lt.f32.partialorder %v2084_v41, 0.0004427343 }
 0x574   :  { %v2712_v28 = vpop.eup %2711  ;;  %v1820_v29 = vadd.f32 %v1819_v27, %v1736_v25 }
 0x575   :  { %v2439_v30 = vpop.f32.mrf.mxu1  ;;  %v2087_v5 = vadd.f32 1.0, %v2712_v28  ;;  %v2090_v40 = vmul.f32 -0.5, %v2712_v28  ;;  %v2083_v43 = vmul.f32 %v2710_v24, %v2082_v39  ;;  %v2093_v47 = vand.u32 2147483647, %v2712_v28 }
 0x576   :  { %v1826_v31 = vmul.f32 %v1820_v29, %v1820_v29 }
 0x577   :  { %v1822_v32 = vpop.f32.mrf.mxu1  ;;  %2715 = vlog2.f32 %v2087_v5  ;;  %v2091_v45 = vadd.f32 1.0, %v2090_v40  ;;  %vm2094_vm4 = vcmp.lt.f32.partialorder %v2093_v47, 0.0004427343 }
 0x578   :  { %v1823_v33 = vadd.f32 %v1822_v32, %v1736_v25  ;;  %1828 = vadd.xlane.f32.xlu1 %v1826_v31 }
 0x579   :  { %v2440_v35 = vpop.f32.mrf.mxu1  ;;  %v2092_v57 = vmul.f32 %v2712_v28, %v2091_v45 }
 0x57a   :  { %v1827_v38 = vmul.f32 %v1823_v33, %v1823_v33 }
 0x57c   :  { %1830 = vadd.xlane.f32.xlu1 %v1827_v38 }
 0x580   :  { %v2714_v42 = vpop.eup %2713 }
 0x581   :  { %v2080_v44 = vmul.f32 0.6931472, %v2714_v42 }
 0x583   :  { %v2086_v48 = vsel %vm2085_vm2, %v2083_v43, %v2080_v44 }
 0x584   :  { %v2716_v53 = vpop.eup %2715  ;;  %v2096_v54 = vsel %vm2070_vm3, %v2068_v18, %v2086_v48 }
 0x585   :  { %v2098_v55 = vadd.f32 0.001, %v2096_v54  ;;  %v2089_v56 = vmul.f32 0.6931472, %v2716_v53 }
 0x587   :  { %2102 = vperm.xlu0 %2447, %v2098_v55   ;;  %v2095_v58 = vsel %vm2094_vm4, %v2092_v57, %v2089_v56 }
 0x588   :  { %v2097_v60 = vsel %vm2071_vm5, %v2069_v22, %v2095_v58 }
 0x589   :  { %v2099_v61 = vadd.f32 0.001, %v2097_v60 }
 0x58d   :  { %2107 = vperm.xlu1 %2448, %v2099_v61  }
 0x601   :  { %v1829_v51 = vpop.xlane.xlu1 %1828 }
 0x602   :  { %v2103_v62 = vpop.permute.xlu0 %2102  ;;  %v1832_v63 = vmax.f32 %v1829_v51, 1e-24 }
 0x603   :  { %2110 = vst [vmem:[%s4029_s11] sm:$0xff] %v2103_v62 }
 0x604   :  { %2717 = vrsqrt.f32 %v1832_v63 }
 0x605   :  { %v1831_v3 = vpop.xlane.xlu1 %1830 }
 0x606   :  { %v1833_v7 = vmax.f32 %v1831_v3, 1e-24 }
 0x608   :  { %2719 = vrsqrt.f32 %v1833_v7 }
 0x609   :  { %v2108_v46 = vpop.permute.xlu1 %2107 }
 0x60a   :  { %2111 = vst [vmem:[%s4029_s11 + $0x8] sm:$0xff] %v2108_v46 }
 0x611   :  { %v2718_v59 = vpop.eup %2717 }
 0x612   :  { %v1836_v6 = vmul.f32 %v2718_v59, %v1820_v29 }
 0x614   :  { %1838 = vst [vmem:[%s4028_s10] sm:$0xff] %v1836_v6 }
 0x615   :  { %v2720_v4 = vpop.eup %2719 }
 0x616   :  { %v1837_v49 = vmul.f32 %v2720_v4, %v1823_v33 }
 0x618   :  { %1839 = vst [vmem:[%s4028_s10 + $0x8] sm:$0xff] %v1837_v49 }
 0x619   :  { %2124 = vsyncpa [#allocation4], 1 }

</bundles_post_ra>
